<compile_context>
chip_gen: v5e
topology: v5e:2x2
jax: 0.10.0
libtpu: 0.0.40
codegen_flags: <defaults>
</compile_context>

<pallas_src>
import jax
import jax.numpy as jnp
from jax.experimental import pallas as pl
from jax.experimental.pallas import tpu as pltpu

EPS = 1e-5
GROUP_SIZE = 4


# ----------------------------- Pallas kernel ------------------------------

def fused_block_kernel(x_ref, w1_ref, w2_ref, sb_ref, o_ref, pad_ref):
    """One grid step = one batch image, fully resident in VMEM.

    x_ref  : (1, H, W, C)   f32 input block (also the residual)
    w1_ref : (9, C, C)      bf16 conv1 taps, tap index = kh*3 + kw
    w2_ref : (9, C, C)      bf16 conv2 taps
    sb_ref : (4, C)         f32 [bn1_scale*gate, bn1_bias*gate, bn2_scale, bn2_bias]
    o_ref  : (1, H, W, C)   f32 output block
    pad_ref: (H+2, W+2, C)  f32 VMEM scratch, reused as both convs' padded input
    """
    _, H, W, C = x_ref.shape
    x = x_ref[0]                                     # (H, W, C) f32, read once

    # conv1 input: zero the halo once, write the interior in place (in-VMEM padding).
    pad_ref[...] = jnp.zeros_like(pad_ref)
    pad_ref[pl.ds(1, H), pl.ds(1, W), :] = x

    def conv3x3(w_ref):
        # 3x3 / stride-1 conv as shifted windows of the padded scratch.
        # bf16 MXU operands, f32 accumulation.
        acc = jnp.zeros((H * W, w_ref.shape[-1]), jnp.float32)
        for kh in range(3):
            for kw in range(3):
                patch = pad_ref[pl.ds(kh, H), pl.ds(kw, W), :].reshape(H * W, C)
                acc = acc + jnp.dot(patch.astype(jnp.bfloat16),
                                    w_ref[kh * 3 + kw],
                                    preferred_element_type=jnp.float32)
        return acc                                    # (H*W, Cout) f32

    # conv1 -> folded bn1 (0/1 channel gate pre-folded into scale/bias) -> relu
    mid = jnp.maximum(conv3x3(w1_ref) * sb_ref[0:1, :] + sb_ref[1:2, :], 0.0)

    # conv2 input never touches HBM: overwrite the interior (halo is still zero).
    pad_ref[pl.ds(1, H), pl.ds(1, W), :] = mid.reshape(H, W, C)

    # conv2 -> folded bn2 -> + residual -> relu
    out = conv3x3(w2_ref) * sb_ref[2:3, :] + sb_ref[3:4, :] + x.reshape(H * W, C)
    o_ref[0] = jnp.maximum(out, 0.0).reshape(H, W, C)


# ------------------------------- JAX glue ---------------------------------

def _weights_to_taps(w_oihw):
    cout, cin, kh, kw = w_oihw.shape
    return jnp.transpose(w_oihw, (2, 3, 1, 0)).reshape(kh * kw, cin, cout)


@jax.jit
def _fused_forward(x_nchw, conv1_w, conv2_w, sb):
    x = jnp.transpose(x_nchw, (0, 2, 3, 1)).astype(jnp.float32)      # NCHW -> NHWC
    N, H, W, C = x.shape
    planes = conv1_w.shape[0]
    w1 = _weights_to_taps(conv1_w).astype(jnp.bfloat16)              # (9, C, planes)
    w2 = _weights_to_taps(conv2_w).astype(jnp.bfloat16)              # (9, planes, planes)

    flops = 2 * N * H * W * 9 * (C * planes + planes * planes)
    bytes_accessed = (x.size + N * H * W * planes + sb.size) * 4 + (w1.size + w2.size) * 2

    out = pl.pallas_call(
        fused_block_kernel,
        out_shape=jax.ShapeDtypeStruct((N, H, W, planes), jnp.float32),
        grid=(N,),
        in_specs=[
            pl.BlockSpec((1, H, W, C), lambda n: (n, 0, 0, 0)),
            pl.BlockSpec((9, C, planes), lambda n: (0, 0, 0)),
            pl.BlockSpec((9, planes, planes), lambda n: (0, 0, 0)),
            pl.BlockSpec((4, planes), lambda n: (0, 0)),
        ],
        out_specs=pl.BlockSpec((1, H, W, planes), lambda n: (n, 0, 0, 0)),
        scratch_shapes=[pltpu.VMEM((H + 2, W + 2, C), jnp.float32)],
        compiler_params=pltpu.CompilerParams(
            dimension_semantics=("parallel",),
            vmem_limit_bytes=32 * 1024 * 1024),
        cost_estimate=pl.CostEstimate(
            flops=flops, transcendentals=0, bytes_accessed=bytes_accessed),
    )(x, w1, w2, sb)

    return jnp.transpose(out, (0, 3, 1, 2))                          # NHWC -> NCHW


def _group_norms(filter_weight, group_size):
    n, c, h, w = filter_weight.shape
    fw = filter_weight.reshape(n // group_size, group_size * c * h * w)
    denom = jnp.maximum(jnp.max(jnp.abs(fw)), 1e-12)                 # guard all-zero weights
    nfw = fw / denom
    return jnp.abs(nfw).sum(axis=1) / (group_size * c * h * w)


def compute_indicator(conv1_w, threshold, group_size=GROUP_SIZE):
    # forward value == hard 0/1 indicator; sigmoid terms preserve the STE semantics
    norm = _group_norms(conv1_w, group_size)
    sig = jax.nn.sigmoid(norm - threshold)
    return (norm > threshold).astype(jnp.float32) - jax.lax.stop_gradient(sig) + sig


def _fold_bn(gamma, beta, mean, var):
    scale = gamma / jnp.sqrt(var + EPS)
    return scale, beta - mean * scale


class SuperPrunedGateBasicBlockPallas:
    expansion = 1

    def __init__(self, inplanes, planes, key, stride=1):
        assert stride == 1 and inplanes == planes, \
            "only the downsample=None / stride=1 configuration is implemented"
        # TODO(synk): stride>1 + downsample branch of forward is not implemented.
        self.inplanes, self.planes = inplanes, planes
        self.group_size = GROUP_SIZE
        self.n_choices = planes // GROUP_SIZE
        ks = jax.random.split(key, 10)
        self.conv1_w = 0.1 * jax.random.normal(ks[0], (planes, inplanes, 3, 3), jnp.float32)
        self.conv2_w = 0.1 * jax.random.normal(ks[1], (planes, planes, 3, 3), jnp.float32)
        self.bn1_gamma = 1.0 + 0.1 * jax.random.normal(ks[2], (planes,), jnp.float32)
        self.bn1_beta = 0.1 * jax.random.normal(ks[3], (planes,), jnp.float32)
        self.bn1_mean = 0.1 * jax.random.normal(ks[4], (planes,), jnp.float32)
        self.bn1_var = 1.0 + 0.2 * jax.random.uniform(ks[5], (planes,), jnp.float32)
        self.bn2_gamma = 1.0 + 0.1 * jax.random.normal(ks[6], (planes,), jnp.float32)
        self.bn2_beta = 0.1 * jax.random.normal(ks[7], (planes,), jnp.float32)
        self.bn2_mean = 0.1 * jax.random.normal(ks[8], (planes,), jnp.float32)
        self.bn2_var = 1.0 + 0.2 * jax.random.uniform(ks[9], (planes,), jnp.float32)
        # nn.Parameter(torch.zeros(1)) in the reference; deterministically set to the mean
        # per-group weight norm so that the gate actually prunes some groups in the test.
        self.channel_thresholds = jnp.mean(_group_norms(self.conv1_w, GROUP_SIZE)).reshape(1)
        self.assigned_indicator = jnp.zeros((self.n_choices,), jnp.float32)
        self.init_state = False

    def params(self):
        return dict(
            w1=self.conv1_w, w2=self.conv2_w,
            bn1=(self.bn1_gamma, self.bn1_beta, self.bn1_mean, self.bn1_var),
            bn2=(self.bn2_gamma, self.bn2_beta, self.bn2_mean, self.bn2_var))

    def forward(self, x_nchw):
        planes = self.planes
        # Python-side state (init flip, gate recompute) stays OUT of the jitted function,
        # so _fused_forward is traced once and reused for both paths.
        if not self.init_state:
            gate = jnp.ones((planes,), jnp.float32)                  # init path: no gate
            self.init_state = True
        else:
            indicator = compute_indicator(self.conv1_w, self.channel_thresholds)
            self.assigned_indicator = indicator
            gate = jnp.repeat(indicator, self.group_size)            # (planes,)

        s1, b1 = _fold_bn(self.bn1_gamma, self.bn1_beta, self.bn1_mean, self.bn1_var)
        s2, b2 = _fold_bn(self.bn2_gamma, self.bn2_beta, self.bn2_mean, self.bn2_var)
        # Forward-exact fold of the 0/1 gate into bn1's scale/bias: relu(y)*g == relu(y*g)
        # for g >= 0.  TODO(synk): keep an explicit post-relu gate (custom_vjp) if the
        # original STE gradient path is needed for training.
        sb = jnp.stack([s1 * gate, b1 * gate, s2, b2], axis=0)       # (4, planes)
        return _fused_forward(x_nchw, self.conv1_w, self.conv2_w, sb)


# --------------------------- pure-JAX reference ----------------------------

def ref_forward(x_nchw, params, gate_per_channel, conv_dtype=jnp.float32):
    """conv_dtype=bfloat16 mirrors the kernel's MXU operand precision (f32 accumulation);
    conv_dtype=float32 is the full-precision module semantics."""
    def conv(x, w):
        return jax.lax.conv_general_dilated(
            x.astype(conv_dtype), w.astype(conv_dtype),
            window_strides=(1, 1), padding=((1, 1), (1, 1)),
            dimension_numbers=("NCHW", "OIHW", "NCHW"),
            preferred_element_type=jnp.float32)

    def bn(y, stats):
        g, b, m, v = stats
        s = g / jnp.sqrt(v + EPS)
        return y * s[None, :, None, None] + (b - m * s)[None, :, None, None]

    out = jax.nn.relu(bn(conv(x_nchw, params["w1"]), params["bn1"]))
    out = out * gate_per_channel[None, :, None, None]
    out = bn(conv(out, params["w2"]), params["bn2"])
    return jax.nn.relu(out + x_nchw)


# --------------------------------- main ------------------------------------

if __name__ == "__main__":
    key = jax.random.PRNGKey(0)
    kx, kp = jax.random.split(key)
    N, C, Hs, Ws = 2, 16, 8, 8                      # inplanes = planes = 16, group_size = 4
    x = jax.random.normal(kx, (N, C, Hs, Ws), jnp.float32)

    block = SuperPrunedGateBasicBlockPallas(C, C, kp)

    out0 = block.forward(x)                          # first call  -> init (ungated) path
    out1 = block.forward(x)                          # second call -> gated path
    jax.block_until_ready((out0, out1))

    gate0 = jnp.ones((C,), jnp.float32)
    gate1 = jnp.repeat(compute_indicator(block.conv1_w, block.channel_thresholds), GROUP_SIZE)

    assert out0.shape == x.shape and out1.shape == x.shape
    # precision-matched reference (bf16 conv operands, f32 accumulation): tight check
    assert float(jnp.max(jnp.abs(out0 - ref_forward(x, block.params(), gate0, jnp.bfloat16)))) < 1e-3, \
        "init-path mismatch vs bf16-matched reference"
    assert float(jnp.max(jnp.abs(out1 - ref_forward(x, block.params(), gate1, jnp.bfloat16)))) < 1e-3, \
        "gated-path mismatch vs bf16-matched reference"
    # full-f32 module semantics: loose bound dominated by bf16 conv-operand rounding
    assert float(jnp.max(jnp.abs(out0 - ref_forward(x, block.params(), gate0, jnp.float32)))) < 1e-1, \
        "init-path mismatch vs f32 reference"
    assert float(jnp.max(jnp.abs(out1 - ref_forward(x, block.params(), gate1, jnp.float32)))) < 1e-1, \
        "gated-path mismatch vs f32 reference"
    print("KERNEL_OK")
</pallas_src>

<mosaic_0001>
module attributes {stable_mosaic.version = 11 : i64} {
  func.func @fused_block_kernel(%arg0: i32, %arg1: memref<1x8x8x16xf32, #tpu.memory_space<vmem>>, %arg2: memref<9x16x16xbf16, #tpu.memory_space<vmem>>, %arg3: memref<9x16x16xbf16, #tpu.memory_space<vmem>>, %arg4: memref<4x16xf32, #tpu.memory_space<vmem>>, %arg5: memref<1x8x8x16xf32, #tpu.memory_space<vmem>>, %arg6: memref<10x10x16xf32, #tpu.memory_space<vmem>>) attributes {dimension_semantics = [#tpu.dimension_semantics<parallel>], iteration_bounds = array<i64: 2>, scalar_prefetch = 0 : i64, scratch_operands = 1 : i64, tpu.core_type = #tpu.core_type<tc>, window_params = [{transform_indices = @transform_0, window_bounds = array<i64: 1, 8, 8, 16>}, {pipeline_mode = #tpu.pipeline_mode<synchronous>, transform_indices = @transform_1, window_bounds = array<i64: 9, 16, 16>}, {pipeline_mode = #tpu.pipeline_mode<synchronous>, transform_indices = @transform_2, window_bounds = array<i64: 9, 16, 16>}, {pipeline_mode = #tpu.pipeline_mode<synchronous>, transform_indices = @transform_3, window_bounds = array<i64: 4, 16>}, {transform_indices = @transform_4, window_bounds = array<i64: 1, 8, 8, 16>}]} {
    %c0 = arith.constant 0 : index
    %c0_0 = arith.constant 0 : index
    %c0_1 = arith.constant 0 : index
    %c0_2 = arith.constant 0 : index
    %0 = vector.load %arg1[%c0, %c0_0, %c0_1, %c0_2] : memref<1x8x8x16xf32, #tpu.memory_space<vmem>>, vector<1x8x8x16xf32>
    %1 = vector.shape_cast %0 : vector<1x8x8x16xf32> to vector<8x8x16xf32>
    %cst = arith.constant 0.000000e+00 : f32
    %2 = vector.broadcast %cst : f32 to vector<10x10x16xf32>
    %c0_3 = arith.constant 0 : index
    %c0_4 = arith.constant 0 : index
    %c0_5 = arith.constant 0 : index
    %3 = vector.load %arg6[%c0_3, %c0_4, %c0_5] : memref<10x10x16xf32, #tpu.memory_space<vmem>>, vector<10x10x16xf32>
    tpu.vector_store %arg6[%c0_3, %c0_4, %c0_5], %2 {strides = array<i32>} : memref<10x10x16xf32, #tpu.memory_space<vmem>>, vector<10x10x16xf32>,
    %c1 = arith.constant 1 : index
    %c1_6 = arith.constant 1 : index
    %c0_7 = arith.constant 0 : index
    %4 = vector.load %arg6[%c1, %c1_6, %c0_7] : memref<10x10x16xf32, #tpu.memory_space<vmem>>, vector<8x8x16xf32>
    tpu.vector_store %arg6[%c1, %c1_6, %c0_7], %1 {strides = array<i32>} : memref<10x10x16xf32, #tpu.memory_space<vmem>>, vector<8x8x16xf32>,
    %cst_8 = arith.constant 0.000000e+00 : f32
    %5 = vector.broadcast %cst_8 : f32 to vector<64x16xf32>
    %c0_9 = arith.constant 0 : index
    %c0_10 = arith.constant 0 : index
    %c0_11 = arith.constant 0 : index
    %6 = vector.load %arg6[%c0_9, %c0_10, %c0_11] : memref<10x10x16xf32, #tpu.memory_space<vmem>>, vector<8x8x16xf32>
    %7 = vector.shape_cast %6 : vector<8x8x16xf32> to vector<64x16xf32>
    %8 = arith.truncf %7 : vector<64x16xf32> to vector<64x16xbf16>
    %c0_12 = arith.constant 0 : index
    %c0_13 = arith.constant 0 : index
    %c0_14 = arith.constant 0 : index
    %9 = vector.load %arg2[%c0_12, %c0_13, %c0_14] : memref<9x16x16xbf16, #tpu.memory_space<vmem>>, vector<1x16x16xbf16>
    %10 = vector.shape_cast %9 : vector<1x16x16xbf16> to vector<16x16xbf16>
    %cst_15 = arith.constant dense<0.000000e+00> : vector<64x16xf32>
    %11 = tpu.matmul %8, %10, %cst_15 {dimension_numbers = #tpu.dot_dimension_numbers<[1], [0], [0], [1], [0, 0, 1, 1], [], []>} : vector<64x16xbf16>, vector<16x16xbf16>, vector<64x16xf32> -> vector<64x16xf32>
    %12 = arith.addf %5, %11 : vector<64x16xf32>
    %c0_16 = arith.constant 0 : index
    %c1_17 = arith.constant 1 : index
    %c0_18 = arith.constant 0 : index
    %13 = vector.load %arg6[%c0_16, %c1_17, %c0_18] : memref<10x10x16xf32, #tpu.memory_space<vmem>>, vector<8x8x16xf32>
    %14 = vector.shape_cast %13 : vector<8x8x16xf32> to vector<64x16xf32>
    %15 = arith.truncf %14 : vector<64x16xf32> to vector<64x16xbf16>
    %c1_19 = arith.constant 1 : index
    %c0_20 = arith.constant 0 : index
    %c0_21 = arith.constant 0 : index
    %16 = vector.load %arg2[%c1_19, %c0_20, %c0_21] : memref<9x16x16xbf16, #tpu.memory_space<vmem>>, vector<1x16x16xbf16>
    %17 = vector.shape_cast %16 : vector<1x16x16xbf16> to vector<16x16xbf16>
    %cst_22 = arith.constant dense<0.000000e+00> : vector<64x16xf32>
    %18 = tpu.matmul %15, %17, %cst_22 {dimension_numbers = #tpu.dot_dimension_numbers<[1], [0], [0], [1], [0, 0, 1, 1], [], []>} : vector<64x16xbf16>, vector<16x16xbf16>, vector<64x16xf32> -> vector<64x16xf32>
    %19 = arith.addf %12, %18 : vector<64x16xf32>
    %c0_23 = arith.constant 0 : index
    %c2 = arith.constant 2 : index
    %c0_24 = arith.constant 0 : index
    %20 = vector.load %arg6[%c0_23, %c2, %c0_24] : memref<10x10x16xf32, #tpu.memory_space<vmem>>, vector<8x8x16xf32>
    %21 = vector.shape_cast %20 : vector<8x8x16xf32> to vector<64x16xf32>
    %22 = arith.truncf %21 : vector<64x16xf32> to vector<64x16xbf16>
    %c2_25 = arith.constant 2 : index
    %c0_26 = arith.constant 0 : index
    %c0_27 = arith.constant 0 : index
    %23 = vector.load %arg2[%c2_25, %c0_26, %c0_27] : memref<9x16x16xbf16, #tpu.memory_space<vmem>>, vector<1x16x16xbf16>
    %24 = vector.shape_cast %23 : vector<1x16x16xbf16> to vector<16x16xbf16>
    %cst_28 = arith.constant dense<0.000000e+00> : vector<64x16xf32>
    %25 = tpu.matmul %22, %24, %cst_28 {dimension_numbers = #tpu.dot_dimension_numbers<[1], [0], [0], [1], [0, 0, 1, 1], [], []>} : vector<64x16xbf16>, vector<16x16xbf16>, vector<64x16xf32> -> vector<64x16xf32>
    %26 = arith.addf %19, %25 : vector<64x16xf32>
    %c1_29 = arith.constant 1 : index
    %c0_30 = arith.constant 0 : index
    %c0_31 = arith.constant 0 : index
    %27 = vector.load %arg6[%c1_29, %c0_30, %c0_31] : memref<10x10x16xf32, #tpu.memory_space<vmem>>, vector<8x8x16xf32>
    %28 = vector.shape_cast %27 : vector<8x8x16xf32> to vector<64x16xf32>
    %29 = arith.truncf %28 : vector<64x16xf32> to vector<64x16xbf16>
    %c3 = arith.constant 3 : index
    %c0_32 = arith.constant 0 : index
    %c0_33 = arith.constant 0 : index
    %30 = vector.load %arg2[%c3, %c0_32, %c0_33] : memref<9x16x16xbf16, #tpu.memory_space<vmem>>, vector<1x16x16xbf16>
    %31 = vector.shape_cast %30 : vector<1x16x16xbf16> to vector<16x16xbf16>
    %cst_34 = arith.constant dense<0.000000e+00> : vector<64x16xf32>
    %32 = tpu.matmul %29, %31, %cst_34 {dimension_numbers = #tpu.dot_dimension_numbers<[1], [0], [0], [1], [0, 0, 1, 1], [], []>} : vector<64x16xbf16>, vector<16x16xbf16>, vector<64x16xf32> -> vector<64x16xf32>
    %33 = arith.addf %26, %32 : vector<64x16xf32>
    %c1_35 = arith.constant 1 : index
    %c1_36 = arith.constant 1 : index
    %c0_37 = arith.constant 0 : index
    %34 = vector.load %arg6[%c1_35, %c1_36, %c0_37] : memref<10x10x16xf32, #tpu.memory_space<vmem>>, vector<8x8x16xf32>
    %35 = vector.shape_cast %34 : vector<8x8x16xf32> to vector<64x16xf32>
    %36 = arith.truncf %35 : vector<64x16xf32> to vector<64x16xbf16>
    %c4 = arith.constant 4 : index
    %c0_38 = arith.constant 0 : index
    %c0_39 = arith.constant 0 : index
    %37 = vector.load %arg2[%c4, %c0_38, %c0_39] : memref<9x16x16xbf16, #tpu.memory_space<vmem>>, vector<1x16x16xbf16>
    %38 = vector.shape_cast %37 : vector<1x16x16xbf16> to vector<16x16xbf16>
    %cst_40 = arith.constant dense<0.000000e+00> : vector<64x16xf32>
    %39 = tpu.matmul %36, %38, %cst_40 {dimension_numbers = #tpu.dot_dimension_numbers<[1], [0], [0], [1], [0, 0, 1, 1], [], []>} : vector<64x16xbf16>, vector<16x16xbf16>, vector<64x16xf32> -> vector<64x16xf32>
    %40 = arith.addf %33, %39 : vector<64x16xf32>
    %c1_41 = arith.constant 1 : index
    %c2_42 = arith.constant 2 : index
    %c0_43 = arith.constant 0 : index
    %41 = vector.load %arg6[%c1_41, %c2_42, %c0_43] : memref<10x10x16xf32, #tpu.memory_space<vmem>>, vector<8x8x16xf32>
    %42 = vector.shape_cast %41 : vector<8x8x16xf32> to vector<64x16xf32>
    %43 = arith.truncf %42 : vector<64x16xf32> to vector<64x16xbf16>
    %c5 = arith.constant 5 : index
    %c0_44 = arith.constant 0 : index
    %c0_45 = arith.constant 0 : index
    %44 = vector.load %arg2[%c5, %c0_44, %c0_45] : memref<9x16x16xbf16, #tpu.memory_space<vmem>>, vector<1x16x16xbf16>
    %45 = vector.shape_cast %44 : vector<1x16x16xbf16> to vector<16x16xbf16>
    %cst_46 = arith.constant dense<0.000000e+00> : vector<64x16xf32>
    %46 = tpu.matmul %43, %45, %cst_46 {dimension_numbers = #tpu.dot_dimension_numbers<[1], [0], [0], [1], [0, 0, 1, 1], [], []>} : vector<64x16xbf16>, vector<16x16xbf16>, vector<64x16xf32> -> vector<64x16xf32>
    %47 = arith.addf %40, %46 : vector<64x16xf32>
    %c2_47 = arith.constant 2 : index
    %c0_48 = arith.constant 0 : index
    %c0_49 = arith.constant 0 : index
    %48 = vector.load %arg6[%c2_47, %c0_48, %c0_49] : memref<10x10x16xf32, #tpu.memory_space<vmem>>, vector<8x8x16xf32>
    %49 = vector.shape_cast %48 : vector<8x8x16xf32> to vector<64x16xf32>
    %50 = arith.truncf %49 : vector<64x16xf32> to vector<64x16xbf16>
    %c6 = arith.constant 6 : index
    %c0_50 = arith.constant 0 : index
    %c0_51 = arith.constant 0 : index
    %51 = vector.load %arg2[%c6, %c0_50, %c0_51] : memref<9x16x16xbf16, #tpu.memory_space<vmem>>, vector<1x16x16xbf16>
    %52 = vector.shape_cast %51 : vector<1x16x16xbf16> to vector<16x16xbf16>
    %cst_52 = arith.constant dense<0.000000e+00> : vector<64x16xf32>
    %53 = tpu.matmul %50, %52, %cst_52 {dimension_numbers = #tpu.dot_dimension_numbers<[1], [0], [0], [1], [0, 0, 1, 1], [], []>} : vector<64x16xbf16>, vector<16x16xbf16>, vector<64x16xf32> -> vector<64x16xf32>
    %54 = arith.addf %47, %53 : vector<64x16xf32>
    %c2_53 = arith.constant 2 : index
    %c1_54 = arith.constant 1 : index
    %c0_55 = arith.constant 0 : index
    %55 = vector.load %arg6[%c2_53, %c1_54, %c0_55] : memref<10x10x16xf32, #tpu.memory_space<vmem>>, vector<8x8x16xf32>
    %56 = vector.shape_cast %55 : vector<8x8x16xf32> to vector<64x16xf32>
    %57 = arith.truncf %56 : vector<64x16xf32> to vector<64x16xbf16>
    %c7 = arith.constant 7 : index
    %c0_56 = arith.constant 0 : index
    %c0_57 = arith.constant 0 : index
    %58 = vector.load %arg2[%c7, %c0_56, %c0_57] : memref<9x16x16xbf16, #tpu.memory_space<vmem>>, vector<1x16x16xbf16>
    %59 = vector.shape_cast %58 : vector<1x16x16xbf16> to vector<16x16xbf16>
    %cst_58 = arith.constant dense<0.000000e+00> : vector<64x16xf32>
    %60 = tpu.matmul %57, %59, %cst_58 {dimension_numbers = #tpu.dot_dimension_numbers<[1], [0], [0], [1], [0, 0, 1, 1], [], []>} : vector<64x16xbf16>, vector<16x16xbf16>, vector<64x16xf32> -> vector<64x16xf32>
    %61 = arith.addf %54, %60 : vector<64x16xf32>
    %c2_59 = arith.constant 2 : index
    %c2_60 = arith.constant 2 : index
    %c0_61 = arith.constant 0 : index
    %62 = vector.load %arg6[%c2_59, %c2_60, %c0_61] : memref<10x10x16xf32, #tpu.memory_space<vmem>>, vector<8x8x16xf32>
    %63 = vector.shape_cast %62 : vector<8x8x16xf32> to vector<64x16xf32>
    %64 = arith.truncf %63 : vector<64x16xf32> to vector<64x16xbf16>
    %c8 = arith.constant 8 : index
    %c0_62 = arith.constant 0 : index
    %c0_63 = arith.constant 0 : index
    %65 = vector.load %arg2[%c8, %c0_62, %c0_63] : memref<9x16x16xbf16, #tpu.memory_space<vmem>>, vector<1x16x16xbf16>
    %66 = vector.shape_cast %65 : vector<1x16x16xbf16> to vector<16x16xbf16>
    %cst_64 = arith.constant dense<0.000000e+00> : vector<64x16xf32>
    %67 = tpu.matmul %64, %66, %cst_64 {dimension_numbers = #tpu.dot_dimension_numbers<[1], [0], [0], [1], [0, 0, 1, 1], [], []>} : vector<64x16xbf16>, vector<16x16xbf16>, vector<64x16xf32> -> vector<64x16xf32>
    %68 = arith.addf %61, %67 : vector<64x16xf32>
    %c0_65 = arith.constant 0 : index
    %c0_66 = arith.constant 0 : index
    %69 = vector.load %arg4[%c0_65, %c0_66] : memref<4x16xf32, #tpu.memory_space<vmem>>, vector<1x16xf32>
    %70 = vector.broadcast %69 : vector<1x16xf32> to vector<64x16xf32>
    %71 = arith.mulf %68, %70 : vector<64x16xf32>
    %c1_67 = arith.constant 1 : index
    %c0_68 = arith.constant 0 : index
    %72 = vector.load %arg4[%c1_67, %c0_68] : memref<4x16xf32, #tpu.memory_space<vmem>>, vector<1x16xf32>
    %73 = vector.broadcast %72 : vector<1x16xf32> to vector<64x16xf32>
    %74 = arith.addf %71, %73 : vector<64x16xf32>
    %cst_69 = arith.constant 0.000000e+00 : f32
    %75 = vector.broadcast %cst_69 : f32 to vector<64x16xf32>
    %76 = arith.maximumf %74, %75 : vector<64x16xf32>
    %77 = vector.shape_cast %76 : vector<64x16xf32> to vector<8x8x16xf32>
    %c1_70 = arith.constant 1 : index
    %c1_71 = arith.constant 1 : index
    %c0_72 = arith.constant 0 : index
    %78 = vector.load %arg6[%c1_70, %c1_71, %c0_72] : memref<10x10x16xf32, #tpu.memory_space<vmem>>, vector<8x8x16xf32>
    tpu.vector_store %arg6[%c1_70, %c1_71, %c0_72], %77 {strides = array<i32>} : memref<10x10x16xf32, #tpu.memory_space<vmem>>, vector<8x8x16xf32>,
    %cst_73 = arith.constant 0.000000e+00 : f32
    %79 = vector.broadcast %cst_73 : f32 to vector<64x16xf32>
    %c0_74 = arith.constant 0 : index
    %c0_75 = arith.constant 0 : index
    %c0_76 = arith.constant 0 : index
    %80 = vector.load %arg6[%c0_74, %c0_75, %c0_76] : memref<10x10x16xf32, #tpu.memory_space<vmem>>, vector<8x8x16xf32>
    %81 = vector.shape_cast %80 : vector<8x8x16xf32> to vector<64x16xf32>
    %82 = arith.truncf %81 : vector<64x16xf32> to vector<64x16xbf16>
    %c0_77 = arith.constant 0 : index
    %c0_78 = arith.constant 0 : index
    %c0_79 = arith.constant 0 : index
    %83 = vector.load %arg3[%c0_77, %c0_78, %c0_79] : memref<9x16x16xbf16, #tpu.memory_space<vmem>>, vector<1x16x16xbf16>
    %84 = vector.shape_cast %83 : vector<1x16x16xbf16> to vector<16x16xbf16>
    %cst_80 = arith.constant dense<0.000000e+00> : vector<64x16xf32>
    %85 = tpu.matmul %82, %84, %cst_80 {dimension_numbers = #tpu.dot_dimension_numbers<[1], [0], [0], [1], [0, 0, 1, 1], [], []>} : vector<64x16xbf16>, vector<16x16xbf16>, vector<64x16xf32> -> vector<64x16xf32>
    %86 = arith.addf %79, %85 : vector<64x16xf32>
    %c0_81 = arith.constant 0 : index
    %c1_82 = arith.constant 1 : index
    %c0_83 = arith.constant 0 : index
    %87 = vector.load %arg6[%c0_81, %c1_82, %c0_83] : memref<10x10x16xf32, #tpu.memory_space<vmem>>, vector<8x8x16xf32>
    %88 = vector.shape_cast %87 : vector<8x8x16xf32> to vector<64x16xf32>
    %89 = arith.truncf %88 : vector<64x16xf32> to vector<64x16xbf16>
    %c1_84 = arith.constant 1 : index
    %c0_85 = arith.constant 0 : index
    %c0_86 = arith.constant 0 : index
    %90 = vector.load %arg3[%c1_84, %c0_85, %c0_86] : memref<9x16x16xbf16, #tpu.memory_space<vmem>>, vector<1x16x16xbf16>
    %91 = vector.shape_cast %90 : vector<1x16x16xbf16> to vector<16x16xbf16>
    %cst_87 = arith.constant dense<0.000000e+00> : vector<64x16xf32>
    %92 = tpu.matmul %89, %91, %cst_87 {dimension_numbers = #tpu.dot_dimension_numbers<[1], [0], [0], [1], [0, 0, 1, 1], [], []>} : vector<64x16xbf16>, vector<16x16xbf16>, vector<64x16xf32> -> vector<64x16xf32>
    %93 = arith.addf %86, %92 : vector<64x16xf32>
    %c0_88 = arith.constant 0 : index
    %c2_89 = arith.constant 2 : index
    %c0_90 = arith.constant 0 : index
    %94 = vector.load %arg6[%c0_88, %c2_89, %c0_90] : memref<10x10x16xf32, #tpu.memory_space<vmem>>, vector<8x8x16xf32>
    %95 = vector.shape_cast %94 : vector<8x8x16xf32> to vector<64x16xf32>
    %96 = arith.truncf %95 : vector<64x16xf32> to vector<64x16xbf16>
    %c2_91 = arith.constant 2 : index
    %c0_92 = arith.constant 0 : index
    %c0_93 = arith.constant 0 : index
    %97 = vector.load %arg3[%c2_91, %c0_92, %c0_93] : memref<9x16x16xbf16, #tpu.memory_space<vmem>>, vector<1x16x16xbf16>
    %98 = vector.shape_cast %97 : vector<1x16x16xbf16> to vector<16x16xbf16>
    %cst_94 = arith.constant dense<0.000000e+00> : vector<64x16xf32>
    %99 = tpu.matmul %96, %98, %cst_94 {dimension_numbers = #tpu.dot_dimension_numbers<[1], [0], [0], [1], [0, 0, 1, 1], [], []>} : vector<64x16xbf16>, vector<16x16xbf16>, vector<64x16xf32> -> vector<64x16xf32>
    %100 = arith.addf %93, %99 : vector<64x16xf32>
    %c1_95 = arith.constant 1 : index
    %c0_96 = arith.constant 0 : index
    %c0_97 = arith.constant 0 : index
    %101 = vector.load %arg6[%c1_95, %c0_96, %c0_97] : memref<10x10x16xf32, #tpu.memory_space<vmem>>, vector<8x8x16xf32>
    %102 = vector.shape_cast %101 : vector<8x8x16xf32> to vector<64x16xf32>
    %103 = arith.truncf %102 : vector<64x16xf32> to vector<64x16xbf16>
    %c3_98 = arith.constant 3 : index
    %c0_99 = arith.constant 0 : index
    %c0_100 = arith.constant 0 : index
    %104 = vector.load %arg3[%c3_98, %c0_99, %c0_100] : memref<9x16x16xbf16, #tpu.memory_space<vmem>>, vector<1x16x16xbf16>
    %105 = vector.shape_cast %104 : vector<1x16x16xbf16> to vector<16x16xbf16>
    %cst_101 = arith.constant dense<0.000000e+00> : vector<64x16xf32>
    %106 = tpu.matmul %103, %105, %cst_101 {dimension_numbers = #tpu.dot_dimension_numbers<[1], [0], [0], [1], [0, 0, 1, 1], [], []>} : vector<64x16xbf16>, vector<16x16xbf16>, vector<64x16xf32> -> vector<64x16xf32>
    %107 = arith.addf %100, %106 : vector<64x16xf32>
    %c1_102 = arith.constant 1 : index
    %c1_103 = arith.constant 1 : index
    %c0_104 = arith.constant 0 : index
    %108 = vector.load %arg6[%c1_102, %c1_103, %c0_104] : memref<10x10x16xf32, #tpu.memory_space<vmem>>, vector<8x8x16xf32>
    %109 = vector.shape_cast %108 : vector<8x8x16xf32> to vector<64x16xf32>
    %110 = arith.truncf %109 : vector<64x16xf32> to vector<64x16xbf16>
    %c4_105 = arith.constant 4 : index
    %c0_106 = arith.constant 0 : index
    %c0_107 = arith.constant 0 : index
    %111 = vector.load %arg3[%c4_105, %c0_106, %c0_107] : memref<9x16x16xbf16, #tpu.memory_space<vmem>>, vector<1x16x16xbf16>
    %112 = vector.shape_cast %111 : vector<1x16x16xbf16> to vector<16x16xbf16>
    %cst_108 = arith.constant dense<0.000000e+00> : vector<64x16xf32>
    %113 = tpu.matmul %110, %112, %cst_108 {dimension_numbers = #tpu.dot_dimension_numbers<[1], [0], [0], [1], [0, 0, 1, 1], [], []>} : vector<64x16xbf16>, vector<16x16xbf16>, vector<64x16xf32> -> vector<64x16xf32>
    %114 = arith.addf %107, %113 : vector<64x16xf32>
    %c1_109 = arith.constant 1 : index
    %c2_110 = arith.constant 2 : index
    %c0_111 = arith.constant 0 : index
    %115 = vector.load %arg6[%c1_109, %c2_110, %c0_111] : memref<10x10x16xf32, #tpu.memory_space<vmem>>, vector<8x8x16xf32>
    %116 = vector.shape_cast %115 : vector<8x8x16xf32> to vector<64x16xf32>
    %117 = arith.truncf %116 : vector<64x16xf32> to vector<64x16xbf16>
    %c5_112 = arith.constant 5 : index
    %c0_113 = arith.constant 0 : index
    %c0_114 = arith.constant 0 : index
    %118 = vector.load %arg3[%c5_112, %c0_113, %c0_114] : memref<9x16x16xbf16, #tpu.memory_space<vmem>>, vector<1x16x16xbf16>
    %119 = vector.shape_cast %118 : vector<1x16x16xbf16> to vector<16x16xbf16>
    %cst_115 = arith.constant dense<0.000000e+00> : vector<64x16xf32>
    %120 = tpu.matmul %117, %119, %cst_115 {dimension_numbers = #tpu.dot_dimension_numbers<[1], [0], [0], [1], [0, 0, 1, 1], [], []>} : vector<64x16xbf16>, vector<16x16xbf16>, vector<64x16xf32> -> vector<64x16xf32>
    %121 = arith.addf %114, %120 : vector<64x16xf32>
    %c2_116 = arith.constant 2 : index
    %c0_117 = arith.constant 0 : index
    %c0_118 = arith.constant 0 : index
    %122 = vector.load %arg6[%c2_116, %c0_117, %c0_118] : memref<10x10x16xf32, #tpu.memory_space<vmem>>, vector<8x8x16xf32>
    %123 = vector.shape_cast %122 : vector<8x8x16xf32> to vector<64x16xf32>
    %124 = arith.truncf %123 : vector<64x16xf32> to vector<64x16xbf16>
    %c6_119 = arith.constant 6 : index
    %c0_120 = arith.constant 0 : index
    %c0_121 = arith.constant 0 : index
    %125 = vector.load %arg3[%c6_119, %c0_120, %c0_121] : memref<9x16x16xbf16, #tpu.memory_space<vmem>>, vector<1x16x16xbf16>
    %126 = vector.shape_cast %125 : vector<1x16x16xbf16> to vector<16x16xbf16>
    %cst_122 = arith.constant dense<0.000000e+00> : vector<64x16xf32>
    %127 = tpu.matmul %124, %126, %cst_122 {dimension_numbers = #tpu.dot_dimension_numbers<[1], [0], [0], [1], [0, 0, 1, 1], [], []>} : vector<64x16xbf16>, vector<16x16xbf16>, vector<64x16xf32> -> vector<64x16xf32>
    %128 = arith.addf %121, %127 : vector<64x16xf32>
    %c2_123 = arith.constant 2 : index
    %c1_124 = arith.constant 1 : index
    %c0_125 = arith.constant 0 : index
    %129 = vector.load %arg6[%c2_123, %c1_124, %c0_125] : memref<10x10x16xf32, #tpu.memory_space<vmem>>, vector<8x8x16xf32>
    %130 = vector.shape_cast %129 : vector<8x8x16xf32> to vector<64x16xf32>
    %131 = arith.truncf %130 : vector<64x16xf32> to vector<64x16xbf16>
    %c7_126 = arith.constant 7 : index
    %c0_127 = arith.constant 0 : index
    %c0_128 = arith.constant 0 : index
    %132 = vector.load %arg3[%c7_126, %c0_127, %c0_128] : memref<9x16x16xbf16, #tpu.memory_space<vmem>>, vector<1x16x16xbf16>
    %133 = vector.shape_cast %132 : vector<1x16x16xbf16> to vector<16x16xbf16>
    %cst_129 = arith.constant dense<0.000000e+00> : vector<64x16xf32>
    %134 = tpu.matmul %131, %133, %cst_129 {dimension_numbers = #tpu.dot_dimension_numbers<[1], [0], [0], [1], [0, 0, 1, 1], [], []>} : vector<64x16xbf16>, vector<16x16xbf16>, vector<64x16xf32> -> vector<64x16xf32>
    %135 = arith.addf %128, %134 : vector<64x16xf32>
    %c2_130 = arith.constant 2 : index
    %c2_131 = arith.constant 2 : index
    %c0_132 = arith.constant 0 : index
    %136 = vector.load %arg6[%c2_130, %c2_131, %c0_132] : memref<10x10x16xf32, #tpu.memory_space<vmem>>, vector<8x8x16xf32>
    %137 = vector.shape_cast %136 : vector<8x8x16xf32> to vector<64x16xf32>
    %138 = arith.truncf %137 : vector<64x16xf32> to vector<64x16xbf16>
    %c8_133 = arith.constant 8 : index
    %c0_134 = arith.constant 0 : index
    %c0_135 = arith.constant 0 : index
    %139 = vector.load %arg3[%c8_133, %c0_134, %c0_135] : memref<9x16x16xbf16, #tpu.memory_space<vmem>>, vector<1x16x16xbf16>
    %140 = vector.shape_cast %139 : vector<1x16x16xbf16> to vector<16x16xbf16>
    %cst_136 = arith.constant dense<0.000000e+00> : vector<64x16xf32>
    %141 = tpu.matmul %138, %140, %cst_136 {dimension_numbers = #tpu.dot_dimension_numbers<[1], [0], [0], [1], [0, 0, 1, 1], [], []>} : vector<64x16xbf16>, vector<16x16xbf16>, vector<64x16xf32> -> vector<64x16xf32>
    %142 = arith.addf %135, %141 : vector<64x16xf32>
    %c2_137 = arith.constant 2 : index
    %c0_138 = arith.constant 0 : index
    %143 = vector.load %arg4[%c2_137, %c0_138] : memref<4x16xf32, #tpu.memory_space<vmem>>, vector<1x16xf32>
    %144 = vector.broadcast %143 : vector<1x16xf32> to vector<64x16xf32>
    %145 = arith.mulf %142, %144 : vector<64x16xf32>
    %c3_139 = arith.constant 3 : index
    %c0_140 = arith.constant 0 : index
    %146 = vector.load %arg4[%c3_139, %c0_140] : memref<4x16xf32, #tpu.memory_space<vmem>>, vector<1x16xf32>
    %147 = vector.broadcast %146 : vector<1x16xf32> to vector<64x16xf32>
    %148 = arith.addf %145, %147 : vector<64x16xf32>
    %149 = vector.shape_cast %1 : vector<8x8x16xf32> to vector<64x16xf32>
    %150 = arith.addf %148, %149 : vector<64x16xf32>
    %cst_141 = arith.constant 0.000000e+00 : f32
    %151 = vector.broadcast %cst_141 : f32 to vector<64x16xf32>
    %152 = arith.maximumf %150, %151 : vector<64x16xf32>
    %153 = vector.shape_cast %152 : vector<64x16xf32> to vector<8x8x16xf32>
    %c0_142 = arith.constant 0 : index
    %c0_143 = arith.constant 0 : index
    %c0_144 = arith.constant 0 : index
    %c0_145 = arith.constant 0 : index
    %154 = vector.load %arg5[%c0_142, %c0_143, %c0_144, %c0_145] : memref<1x8x8x16xf32, #tpu.memory_space<vmem>>, vector<1x8x8x16xf32>
    %155 = vector.shape_cast %154 : vector<1x8x8x16xf32> to vector<8x8x16xf32>
    %156 = vector.shape_cast %153 : vector<8x8x16xf32> to vector<1x8x8x16xf32>
    tpu.vector_store %arg5[%c0_142, %c0_143, %c0_144, %c0_145], %156 {strides = array<i32>} : memref<1x8x8x16xf32, #tpu.memory_space<vmem>>, vector<1x8x8x16xf32>,
    return
  }
  func.func @transform_0(%arg0: i32) -> (i32, i32, i32, i32) {
    %c0_i32 = arith.constant 0 : i32
    %c0_i32_0 = arith.constant 0 : i32
    %c0_i32_1 = arith.constant 0 : i32
    %c0_i32_2 = arith.constant 0 : i32
    return %arg0, %c0_i32, %c0_i32_0, %c0_i32_1 : i32, i32, i32, i32
  }
  func.func @transform_1(%arg0: i32) -> (i32, i32, i32) {
    %c0_i32 = arith.constant 0 : i32
    %c0_i32_0 = arith.constant 0 : i32
    %c0_i32_1 = arith.constant 0 : i32
    %c0_i32_2 = arith.constant 0 : i32
    return %c0_i32, %c0_i32_0, %c0_i32_1 : i32, i32, i32
  }
  func.func @transform_2(%arg0: i32) -> (i32, i32, i32) {
    %c0_i32 = arith.constant 0 : i32
    %c0_i32_0 = arith.constant 0 : i32
    %c0_i32_1 = arith.constant 0 : i32
    %c0_i32_2 = arith.constant 0 : i32
    return %c0_i32, %c0_i32_0, %c0_i32_1 : i32, i32, i32
  }
  func.func @transform_3(%arg0: i32) -> (i32, i32) {
    %c0_i32 = arith.constant 0 : i32
    %c0_i32_0 = arith.constant 0 : i32
    %c0_i32_1 = arith.constant 0 : i32
    return %c0_i32, %c0_i32_0 : i32, i32
  }
  func.func @transform_4(%arg0: i32) -> (i32, i32, i32, i32) {
    %c0_i32 = arith.constant 0 : i32
    %c0_i32_0 = arith.constant 0 : i32
    %c0_i32_1 = arith.constant 0 : i32
    %c0_i32_2 = arith.constant 0 : i32
    return %arg0, %c0_i32, %c0_i32_0, %c0_i32_1 : i32, i32, i32, i32
  }
}

</mosaic_0001>

<bundles_post_ra>
// kernel: _fused_forward.1
= control target key start
LH: loop header
LB: loop body
LE: loop exit
PB: predicated region body
PF: predicated region fallthrough
CT: control target
= control target key end

     0   :  { %9 = vsyncpa [#allocation4], 0  ;;  %s2559_s0 = inlined_call_operand.vmem [shape: f32[2,8,8,16], index: 0, kind: input, shape index: {}]   ;;  %s2560_s1 = inlined_call_operand.vmem [shape: bf16[9,16,16], index: 1, kind: input, shape index: {}]   ;;  %s2561_s2 = inlined_call_operand.vmem [shape: bf16[9,16,16], index: 2, kind: input, shape index: {}]   ;;  %s2562_s3 = inlined_call_operand.vmem [shape: f32[4,16], index: 3, kind: input, shape index: {}]   ;;  %s2563_s4 = inlined_call_operand.hbm [shape: f32[2,8,8,16], index: 4, kind: output, shape index: {}]  }
   0x1   :  { %11 = vsyncpa [#allocation4 + $0x1], 0  ;;  %s1969_s15 = smov 0   ;;  %s1971_s16 = smov 0  }
   0x2   :  { %s1973_s17 = smov 0   ;;  %s1975_s18 = smov 0  }
   0x3 LB: > { %s1990_s19 = sadd.s32 4294967295, %s1939_s18   ;;  %s1621_s20 = sadd.s32 4294967294, %s1939_s18   ;;  %s1939_s18 = sphi %s1975_s18, %s2572_s18   ;;  %s1935_s17 = sphi %s1973_s17, %s2571_s17   ;;  %s1931_s16 = sphi %s1971_s16, %s2570_s16   ;;  %s1927_s15 = sphi %s1969_s15, %s2569_s15  }
   0x4   : > { %s1994_s21 = sadd.s32 1, %s1939_s18   ;;  %s113_s22 = sadd.s32 1, %s1935_s17 }
   0x5   : > { %s110_s23 = ssub.s32 %s1939_s18, %s1994_s21  ;;  %p123_p0 = scmp.ne.s32.totalorder %s1935_s17, %s1931_s16 }
   0x6   : > { %p111_p1 = scmp.eq.s32.totalorder %s110_s23, 0  ;;  %p124_p2 = scmp.eq.s32.totalorder %s1990_s19, 1 }
   0x7   : > { %p129_p3 = scmp.ne.s32.totalorder %s1931_s16, %s1927_s15  ;;  %p130_p4 = scmp.eq.s32.totalorder %s1621_s20, 1 }
   0x8   : > { %s2005_s24 = scalar_select %p111_p1, %s1935_s17, %s113_s22  }
   0x9   : > { %p2007_p5 = por %p124_p2, %p123_p0  ;;  %p2011_p6 = por %p130_p4, %p129_p3 }
   0xa   : > { %p1624_p7 = scmp.ge.s32.totalorder %s1939_s18, 1  ;;  %p165_p8 = scmp.lt.s32.totalorder %s1939_s18, 3 }
   0xc   : > { %p166_p9 = pnand %p1624_p7, %p165_p8 }
   0xe   : > { %169 = sbr.rel (%p166_p9) target bundleno = 616 (0x268), region = 36 }
  0x13   : > { %v1811_v0 = vld [vmem:[%s2560_s1 + $0x8] sm:$0xff]  ;;  %v1810_v1 = vld [vmem:[%s2560_s1] sm:$0xff]  ;;  %p191_p10 = scmp.lt.s32.totalorder %s1990_s19, 1  ;;  %vm205_vm0 = vcmask 130048   ;;  %vm207_vm1 = vcmask 123904   ;;  %v1941_v2 = vmov 0.0  }
  0x14   : > { %215 = vst.msk [vmem:[#allocation2 + $0x40] sm:$0xff] %vm205_vm0, %v1941_v2  ;;  %v1812_v3 = vld [vmem:[%s2560_s1 + $0x10] sm:$0xff]  ;;  %v1813_v4 = vld [vmem:[%s2560_s1 + $0x18] sm:$0xff]  ;;  %v1814_v5 = vld [vmem:[%s2560_s1 + $0x20] sm:$0xff]  ;;  %1829 = vmatpush.bf16.msra.mxu2 %v1811_v0  ;;  %1830 = vmatpush.bf16.msra.mxu3 %v1810_v1  ;;  %s188_s22 = sand.u32 1, %s1931_s16   ;;  %s1828_s28 = sshll.u32 %s1990_s19, 6 }
  0x15   : > { %s192_s11 = scalar_select %p191_p10, %s1990_s19, 1  ;;  %216 = vst.msk [vmem:[#allocation2 + $0x48] sm:$0x3] %vm207_vm1, %v1941_v2  ;;  %290 = vmatpush.bf16.msra.mxu0 %v1811_v0  ;;  %337 = vmatpush.bf16.msra.mxu1 %v1810_v1  ;;  %v1816_v14 = vld [vmem:[%s2560_s1 + $0x30] sm:$0xff]  ;;  %v1817_v32 = vld [vmem:[%s2560_s1 + $0x38] sm:$0xff]  ;;  %v1815_v33 = vld [vmem:[%s2560_s1 + $0x28] sm:$0xff] }
  0x16   : > { %217 = vst.msk [vmem:[#allocation2 + $0x50] sm:$0xff] %vm205_vm0, %v1941_v2  ;;  %v1818_v34 = vld [vmem:[%s2560_s1 + $0x40] sm:$0xff]  ;;  %s1625_s23 = sshll.u32 %s188_s22, 6  ;;  %s1555_s5 = scalar_lea.hbm %s2563_s4, %s1828_s28 }
  0x17   : > { %s1809_s12 = sshll.u32 %s192_s11, 6  ;;  %218 = vst.msk [vmem:[#allocation2 + $0x58] sm:$0x3] %vm207_vm1, %v1941_v2  ;;  %s2468_s27 = scalar_lea.vmem [#allocation3], %s1625_s23 }
  0x18   : > { %399 = vmatpush.bf16.msrb.mxu2 %v1812_v3  ;;  %469 = vmatpush.bf16.msrb.mxu3 %v1813_v4  ;;  %s2041_s20 = scalar_lea.vmem %s2559_s0, %s1809_s12  ;;  %206 = vst.msk [vmem:[#allocation2] sm:$0xff] %vm205_vm0, %v1941_v2  ;;  %s1556_s6 = sshll.u32 %s2468_s27, 4  ;;  %s1557_s6 = int_to_ptr.vmem [resolvable:$true] %s1556_s6 }
  0x19   : > { %539 = vmatpush.bf16.msrb.mxu0 %v1814_v5  ;;  %v2045_v6 = vld [vmem:[%s2041_s20 + $0x18] sm:$0xff]  ;;  %v2048_v7 = vld [vmem:[%s2041_s20 + $0x20] sm:$0xff]  ;;  %208 = vst.msk [vmem:[#allocation2 + $0x8] sm:$0x3] %vm207_vm1, %v1941_v2  ;;  %v2095_v16 = vld [vmem:[%s2041_s20 + $0x28] sm:$0xff]  ;;  %609 = vmatpush.bf16.msrb.mxu1 %v1815_v33  ;;  %s1558_s7 = sshll.u32 %s1555_s5, 4  ;;  %s1559_s7 = int_to_ptr.hbm [resolvable:$true] %s1558_s7 }
  0x1a   : > { %231 = vst.msk [vmem:[#allocation2 + $0x41] sm:$0xff] %vm205_vm0, %v2045_v6  ;;  %v2091_v15 = vld [vmem:[%s2041_s20] sm:$0xff]  ;;  %v2099_v17 = vld [vmem:[%s2041_s20 + $0x30] sm:$0xff]  ;;  %v2104_v18 = vld [vmem:[%s2041_s20 + $0x8] sm:$0xff]  ;;  %s1544_s19 = scalar_lea.sflag [#allocation4], %s188_s22  ;;  %s1891_s8 = sshra.s32 %s1559_s7, 4  ;;  %s1892_s8 = int_to_ptr.hbm [resolvable:$true] %s1891_s8 }
  0x1b   : > { %232 = vst.msk [vmem:[#allocation2 + $0x51] sm:$0xff] %vm205_vm0, %v2048_v7  ;;  %v2109_v19 = vld [vmem:[%s2041_s20 + $0x10] sm:$0xff]  ;;  %v2158_v51 = vld [vmem:[%s2041_s20 + $0x38] sm:$0xff]  ;;  %s1893_s9 = scalar_lea.hbm %s1892_s8, 64  ;;  %s1897_s12 = scalar_lea.hbm %s2563_s4, 128 }
  0x1c   : > { %209 = vst.msk [vmem:[#allocation2 + $0x10] sm:$0xff] %vm205_vm0, %v1941_v2  ;;  %p1894_p11 = scmp.ne.s32.totalorder %s1892_s8, %s1893_s9  ;;  %p1898_p0 = scmp.lt.s32.totalorder %s1892_s8, %s2563_s4 }
  0x1d   : > { %210 = vst.msk [vmem:[#allocation2 + $0x18] sm:$0x3] %vm207_vm1, %v1941_v2  ;;  %p1899_p1 = scmp.lt.s32.totalorder %s1897_s12, %s1893_s9 }
  0x1e   : > { %211 = vst.msk [vmem:[#allocation2 + $0x20] sm:$0xff] %vm205_vm0, %v1941_v2  ;;  %p1895_p12 = pnand %p1894_p11, %p2007_p5 }
  0x1f   : > { %212 = vst.msk [vmem:[#allocation2 + $0x28] sm:$0x3] %vm207_vm1, %v1941_v2  ;;  %v2119_v21 = vld [vmem:[#allocation2] sm:$0xff]  ;;  %p1900_p2 = por %p1899_p1, %p1898_p0 }
  0x20   : > { %213 = vst.msk [vmem:[#allocation2 + $0x30] sm:$0xff] %vm205_vm0, %v1941_v2  ;;  %v2117_v20 = vld [vmem:[#allocation2 + $0x1] sm:$0xff]  ;;  %p1896_p13 = pneg %p1895_p12 }
  0x21   : > { %v2060_v8 = vld [vmem:[#allocation2 + $0x41] sm:$0xff]  ;;  %214 = vst.msk [vmem:[#allocation2 + $0x38] sm:$0x3] %vm207_vm1, %v1941_v2 }
  0x22   : > { %v2063_v9 = vld [vmem:[#allocation2 + $0x40] sm:$0xff]  ;;  %v2065_v10 = vld [vmem:[#allocation2 + $0x51] sm:$0xff]  ;;  %219 = vst.msk [vmem:[#allocation2 + $0x60] sm:$0xff] %vm205_vm0, %v1941_v2  ;;  %p1901_p3 = pnand %p1900_p2, %p1896_p13 }
  0x23   : > { %v2068_v11 = vld [vmem:[#allocation2 + $0x50] sm:$0xff]  ;;  %v2072_v12 = vpack.c.bf16 %v2065_v10, %v2060_v8  ;;  %220 = vst.msk [vmem:[#allocation2 + $0x68] sm:$0x3] %vm207_vm1, %v1941_v2  ;;  %v2145_v39 = vld [vmem:[#allocation2 + $0x2] sm:$0xff] }
  0x24   : > { %v2077_v13 = vpack.c.bf16 %v2068_v11, %v2063_v9  ;;  %221 = vst.msk [vmem:[#allocation2 + $0x70] sm:$0xff] %vm205_vm0, %v1941_v2  ;;  %v572_v52 = vld [vmem:[#allocation2 + $0x42] sm:$0xff]  ;;  %v364_v53 = vld [vmem:[#allocation2 + $0x52] sm:$0xff] }
  0x25   : > { %1636 = vmatmul.msk.bf16.vlgmr.msra.gmra.mxu2 %vm205_vm0, %v2072_v12  ;;  %222 = vst.msk [vmem:[#allocation2 + $0x78] sm:$0x3] %vm207_vm1, %v1941_v2  ;;  %v369_v56 = vpack.c.bf16 %v364_v53, %v572_v52 }
  0x26   : > { %1644 = vmatmul.msk.bf16.vlgmr.msra.gmra.mxu3 %vm205_vm0, %v2077_v13  ;;  %223 = vst.msk [vmem:[#allocation2 + $0x80] sm:$0xff] %vm205_vm0, %v1941_v2  ;;  %680 = vmatpush.bf16.msra.mxu2 %v1816_v14 }
  0x27   : > { %224 = vst.msk [vmem:[#allocation2 + $0x88] sm:$0x3] %vm207_vm1, %v1941_v2  ;;  %750 = vmatpush.bf16.msra.mxu3 %v1817_v32 }
  0x28   : > { %225 = vst.msk [vmem:[#allocation2 + $0x90] sm:$0xff] %vm205_vm0, %v1941_v2 }
  0x29   : > { %226 = vst.msk [vmem:[#allocation2 + $0x98] sm:$0x3] %vm207_vm1, %v1941_v2 }
  0x2a   : > { %228 = vst.msk [vmem:[#allocation2 + $0x11] sm:$0xff] %vm205_vm0, %v2091_v15 }
  0x2b   : > { %233 = vst.msk [vmem:[#allocation2 + $0x61] sm:$0xff] %vm205_vm0, %v2095_v16 }
  0x2c   : > { %234 = vst.msk [vmem:[#allocation2 + $0x71] sm:$0xff] %vm205_vm0, %v2099_v17 }
  0x2d   : > { %229 = vst.msk [vmem:[#allocation2 + $0x21] sm:$0xff] %vm205_vm0, %v2104_v18 }
  0x2e   : > { %230 = vst.msk [vmem:[#allocation2 + $0x31] sm:$0xff] %vm205_vm0, %v2109_v19 }
  0x2f   : > { %2567 = vst [vmem:[#allocation6_spill] sm:$0xff] %v2158_v51 }
  0x30   : > { %235 = vst.msk [vmem:[#allocation2 + $0x81] sm:$0xff] %vm205_vm0, %v2158_v51 }
  0x31   : > { %v251_v22 = vld [vmem:[#allocation2 + $0x11] sm:$0xff] }
  0x32   : > { %v237_v23 = vld [vmem:[#allocation2 + $0x10] sm:$0xff]  ;;  %v258_v24 = vpack.c.bf16 %v251_v22, %v2117_v20  ;;  %v256_v26 = vld [vmem:[#allocation2 + $0x61] sm:$0xff] }
  0x33   : > { %v244_v25 = vpack.c.bf16 %v237_v23, %v2119_v21  ;;  %v242_v27 = vld [vmem:[#allocation2 + $0x60] sm:$0xff]  ;;  %v2123_v28 = vld [vmem:[#allocation2 + $0x71] sm:$0xff]  ;;  %v509_v61 = vpack.c.bf16 %v256_v26, %v2065_v10 }
  0x34   : > { %v243_v29 = vld [vmem:[#allocation2 + $0x70] sm:$0xff]  ;;  %1634 = vmatmul.msk.bf16.vlgmr.msra.gmra.mxu0 %vm205_vm0, %v258_v24  ;;  %v2128_v30 = vpack.c.bf16 %v2123_v28, %v256_v26  ;;  %v252_v35 = vld [vmem:[#allocation2 + $0x21] sm:$0xff]  ;;  %v439_v57 = vpack.c.bf16 %v242_v27, %v2068_v11 }
  0x35   : > { %1642 = vmatmul.msk.bf16.vlgmr.msra.gmra.mxu1 %vm205_vm0, %v244_v25  ;;  %v2130_v31 = vpack.c.bf16 %v243_v29, %v242_v27  ;;  %820 = vmatpush.bf16.msra.mxu0 %v1818_v34  ;;  %v253_v36 = vld [vmem:[#allocation2 + $0x31] sm:$0xff]  ;;  %v238_v37 = vld [vmem:[#allocation2 + $0x20] sm:$0xff]  ;;  %v507_v47 = vpack.c.bf16 %v252_v35, %v251_v22  ;;  %v1820_v34 = vld [vmem:[%s2561_s2 + $0x8] sm:$0xff] }
  0x36   : > { %1637 = vmatmul.msk.bf16.gmra.mxu2 %vm205_vm0, %v2128_v30  ;;  %v239_v38 = vld [vmem:[#allocation2 + $0x30] sm:$0xff]  ;;  %v259_v41 = vpack.c.bf16 %v253_v36, %v252_v35  ;;  %v437_v44 = vpack.c.bf16 %v238_v37, %v237_v23  ;;  %v570_v45 = vld [vmem:[#allocation2 + $0x22] sm:$0xff]  ;;  %v508_v54 = vpack.c.bf16 %v2060_v8, %v253_v36  ;;  %940 = vmatpush.bf16.msra.mxu1 %v1820_v34 }
  0x37   : > { %1645 = vmatmul.msk.bf16.gmra.mxu3 %vm205_vm0, %v2130_v31  ;;  %v360_v40 = vld [vmem:[#allocation2 + $0x12] sm:$0xff]  ;;  %v245_v42 = vpack.c.bf16 %v239_v38, %v238_v37  ;;  %v438_v50 = vpack.c.bf16 %v2063_v9, %v239_v38  ;;  %v574_v58 = vld [vmem:[#allocation2 + $0x62] sm:$0xff] }
  0x38   : > { %v367_v43 = vpack.c.bf16 %v360_v40, %v2145_v39  ;;  %v362_v46 = vld [vmem:[#allocation2 + $0x32] sm:$0xff]  ;;  %v577_v48 = vpack.c.bf16 %v570_v45, %v360_v40  ;;  %v436_v60 = vld [vmem:[#allocation2 + $0x80] sm:$0xff]  ;;  %v579_v62 = vpack.c.bf16 %v574_v58, %v364_v53 }
  0x39   : > { %v368_v49 = vpack.c.bf16 %v362_v46, %v570_v45  ;;  %v578_v55 = vpack.c.bf16 %v572_v52, %v362_v46  ;;  %v366_v59 = vld [vmem:[#allocation2 + $0x72] sm:$0xff]  ;;  %v440_v0 = vpack.c.bf16 %v436_v60, %v243_v29  ;;  %v506_v1 = vld [vmem:[#allocation2 + $0x81] sm:$0xff] }
  0x3a   : > { %v370_v63 = vpack.c.bf16 %v366_v59, %v574_v58  ;;  %v576_v2 = vld [vmem:[#allocation2 + $0x82] sm:$0xff]  ;;  %v510_v3 = vpack.c.bf16 %v506_v1, %v2123_v28  ;;  %v2190_v10 = vld [vmem:[#allocation2 + $0x90] sm:$0xff] }
  0x3b   : > { %v580_v4 = vpack.c.bf16 %v576_v2, %v366_v59  ;;  %v2192_v11 = vld [vmem:[#allocation2 + $0x91] sm:$0xff]  ;;  %v651_v22 = vpack.c.bf16 %v2190_v10, %v436_v60 }
  0x3c   : > { %v721_v23 = vpack.c.bf16 %v2192_v11, %v506_v1  ;;  %v2205_v28 = vld [vmem:[#allocation2 + $0x92] sm:$0xff] }
  0x3d   : > { %v791_v29 = vpack.c.bf16 %v2205_v28, %v576_v2 }
  0x44   : > { %1635 = vmatmul.msk.bf16.gmra.mxu0 %vm205_vm0, %v259_v41 }
  0x45   : > { %1643 = vmatmul.msk.bf16.gmra.mxu1 %vm205_vm0, %v245_v42 }
  0x46   : > { %1652 = vmatmul.msk.bf16.vlgmr.msrb.gmra.mxu2 %vm205_vm0, %v367_v43 }
  0x47   : > { %1662 = vmatmul.msk.bf16.vlgmr.msrb.gmra.mxu3 %vm205_vm0, %v437_v44 }
  0x54   : > { %1672 = vmatmul.msk.bf16.vlgmr.msrb.gmra.mxu0 %vm205_vm0, %v507_v47 }
  0x55   : > { %1682 = vmatmul.msk.bf16.vlgmr.msrb.gmra.mxu1 %vm205_vm0, %v577_v48 }
  0x56   : > { %1653 = vmatmul.msk.bf16.gmra.mxu2 %vm205_vm0, %v368_v49 }
  0x57   : > { %1663 = vmatmul.msk.bf16.gmra.mxu3 %vm205_vm0, %v438_v50 }
  0x64   : > { %1673 = vmatmul.msk.bf16.gmra.mxu0 %vm205_vm0, %v508_v54 }
  0x65   : > { %1683 = vmatmul.msk.bf16.gmra.mxu1 %vm205_vm0, %v578_v55 }
  0x66   : > { %1654 = vmatmul.msk.bf16.gmra.mxu2 %vm205_vm0, %v369_v56 }
  0x67   : > { %1664 = vmatmul.msk.bf16.gmra.mxu3 %vm205_vm0, %v439_v57 }
  0x74   : > { %1674 = vmatmul.msk.bf16.gmra.mxu0 %vm205_vm0, %v509_v61 }
  0x75   : > { %1684 = vmatmul.msk.bf16.gmra.mxu1 %vm205_vm0, %v579_v62 }
  0x76   : > { %1655 = vmatmul.msk.bf16.gmra.mxu2 %vm205_vm0, %v370_v63 }
  0x77   : > { %1665 = vmatmul.msk.bf16.gmra.mxu3 %vm205_vm0, %v440_v0 }
  0x84   : > { %1675 = vmatmul.msk.bf16.gmra.mxu0 %vm205_vm0, %v510_v3 }
  0x85   : > { %1685 = vmatmul.msk.bf16.gmra.mxu1 %vm205_vm0, %v580_v4 }
  0x86   : > { %1692 = vmatmul.msk.bf16.vlgmr.msra.gmra.mxu2 %vm205_vm0, %v245_v42 }
  0x87   : > { %1702 = vmatmul.msk.bf16.vlgmr.msra.gmra.mxu3 %vm205_vm0, %v259_v41 }
  0x94   : > { %1712 = vmatmul.msk.bf16.vlgmr.msra.gmra.mxu0 %vm205_vm0, %v368_v49 }
  0x96   : > { %1693 = vmatmul.msk.bf16.gmra.mxu2 %vm205_vm0, %v2077_v13 }
  0x97   : > { %1703 = vmatmul.msk.bf16.gmra.mxu3 %vm205_vm0, %v2072_v12 }
  0xa4   : > { %1713 = vmatmul.msk.bf16.gmra.mxu0 %vm205_vm0, %v369_v56 }
  0xa6   : > { %1694 = vmatmul.msk.bf16.gmra.mxu2 %vm205_vm0, %v2130_v31 }
  0xa7   : > { %1704 = vmatmul.msk.bf16.gmra.mxu3 %vm205_vm0, %v2128_v30 }
  0xa8   : > { %v302_v5 = vpop.f32.mrf.mxu2 }
  0xa9   : > { %v349_v8 = vpop.f32.mrf.mxu3 }
  0xaa   : > { %v2188_v9 = vadd.f32 %v349_v8, %v302_v5  ;;  %v1819_v5 = vld [vmem:[%s2561_s2] sm:$0xff]  ;;  %v1821_v8 = vld [vmem:[%s2561_s2 + $0x10] sm:$0xff] }
  0xab   : > { %987 = vmatpush.bf16.msrb.mxu2 %v1819_v5  ;;  %1049 = vmatpush.bf16.msrb.mxu3 %v1821_v8 }
  0xb0   : > { %v2194_v13 = vpop.f32.mrf.mxu2 }
  0xb1   : > { %v2196_v14 = vpop.f32.mrf.mxu3  ;;  %v292_v12 = vpop.f32.mrf.mxu0 }
  0xb2   : > { %v339_v37 = vpop.f32.mrf.mxu1 }
  0xb3   : > { %v340_v62 = vadd.f32 %v339_v37, %v292_v12  ;;  %v1823_v37 = vld [vmem:[%s2561_s2 + $0x20] sm:$0xff] }
  0xb4   : > { %1714 = vmatmul.msk.bf16.gmra.mxu0 %vm205_vm0, %v370_v63  ;;  %1189 = vmatpush.bf16.msrb.mxu1 %v1823_v37 }
  0xb6   : > { %1695 = vmatmul.msk.bf16.gmra.mxu2 %vm205_vm0, %v651_v22 }
  0xb7   : > { %1705 = vmatmul.msk.bf16.gmra.mxu3 %vm205_vm0, %v721_v23 }
  0xb9   : > { %v294_v24 = vpop.f32.mrf.mxu0  ;;  %v307_v25 = vpop.f32.mrf.mxu2 }
  0xba   : > { %v354_v26 = vpop.f32.mrf.mxu3  ;;  %v341_v45 = vpop.f32.mrf.mxu1 }
  0xbb   : > { %v2203_v27 = vadd.f32 %v354_v26, %v307_v25  ;;  %v342_v22 = vadd.f32 %v341_v45, %v294_v24 }
  0xc1   : > { %v297_v30 = vpop.f32.mrf.mxu0  ;;  %v2208_v31 = vpop.f32.mrf.mxu2 }
  0xc2   : > { %v2210_v32 = vpop.f32.mrf.mxu3  ;;  %v344_v49 = vpop.f32.mrf.mxu1 }
  0xc4   : > { %1715 = vmatmul.msk.bf16.gmra.mxu0 %vm205_vm0, %v791_v29 }
  0xc9   : > { %v2213_v33 = vpop.f32.mrf.mxu0  ;;  %v401_v35 = vpop.f32.mrf.mxu2 }
  0xca   : > { %v471_v36 = vpop.f32.mrf.mxu3  ;;  %v346_v54 = vpop.f32.mrf.mxu1  ;;  %v421_v63 = vadd.f32 %v401_v35, %v340_v62  ;;  %v345_v62 = vadd.f32 %v344_v49, %v297_v30  ;;  %v2264_v30 = vld [vmem:[%s2562_s3 + $0x1] ss:$0 sm:$0xff] }
  0xcc   : > { %v491_v0 = vadd.f32 %v471_v36, %v421_v63  ;;  %v1822_v36 = vld [vmem:[%s2561_s2 + $0x18] sm:$0xff] }
  0xcd   : > { %1119 = vmatpush.bf16.msrb.mxu0 %v1822_v36 }
  0xd1   : > { %v541_v38 = vpop.f32.mrf.mxu0  ;;  %v403_v40 = vpop.f32.mrf.mxu2 }
  0xd2   : > { %v473_v41 = vpop.f32.mrf.mxu3  ;;  %v611_v58 = vpop.f32.mrf.mxu1  ;;  %v561_v12 = vadd.f32 %v541_v38, %v491_v0  ;;  %v422_v23 = vadd.f32 %v403_v40, %v342_v22 }
  0xd4   : > { %v631_v25 = vadd.f32 %v611_v58, %v561_v12  ;;  %v492_v26 = vadd.f32 %v473_v41, %v422_v23  ;;  %v2259_v58 = vld [vmem:[%s2562_s3] ss:$0 sm:$0xff] }
  0xd9   : > { %v543_v42 = vpop.f32.mrf.mxu0  ;;  %v406_v43 = vpop.f32.mrf.mxu2 }
  0xda   : > { %v476_v44 = vpop.f32.mrf.mxu3  ;;  %v613_v1 = vpop.f32.mrf.mxu1  ;;  %v562_v38 = vadd.f32 %v543_v42, %v492_v26  ;;  %v423_v40 = vadd.f32 %v406_v43, %v345_v62  ;;  %v347_v42 = vadd.f32 %v346_v54, %v2213_v33 }
  0xdc   : > { %v632_v63 = vadd.f32 %v613_v1, %v562_v38  ;;  %v493_v0 = vadd.f32 %v476_v44, %v423_v40 }
  0xe1   : > { %v546_v46 = vpop.f32.mrf.mxu0  ;;  %v408_v47 = vpop.f32.mrf.mxu2 }
  0xe2   : > { %v478_v48 = vpop.f32.mrf.mxu3  ;;  %v616_v24 = vpop.f32.mrf.mxu1  ;;  %v563_v23 = vadd.f32 %v546_v46, %v493_v0 }
  0xe9   : > { %v2218_v50 = vpop.f32.mrf.mxu0  ;;  %v2220_v52 = vpop.f32.mrf.mxu2 }
  0xea   : > { %v2222_v53 = vpop.f32.mrf.mxu3  ;;  %v618_v26 = vpop.f32.mrf.mxu1  ;;  %v425_v46 = vadd.f32 %v2220_v52, %v2188_v9 }
  0xec   : > { %v495_v0 = vadd.f32 %v2222_v53, %v425_v46  ;;  %v352_v53 = vadd.f32 %v2196_v14, %v2194_v13 }
  0xf1   : > { %v2224_v55 = vpop.f32.mrf.mxu0  ;;  %v2226_v56 = vpop.f32.mrf.mxu2 }
  0xf2   : > { %v2228_v57 = vpop.f32.mrf.mxu3 }
  0xf9   : > { %v2230_v59 = vpop.f32.mrf.mxu0  ;;  %v2232_v60 = vpop.f32.mrf.mxu2 }
  0xfa   : > { %v2234_v61 = vpop.f32.mrf.mxu3 }
 0x101   : > { %v2236_v2 = vpop.f32.mrf.mxu0  ;;  %v2238_v3 = vpop.f32.mrf.mxu2 }
 0x102   : > { %v2240_v4 = vpop.f32.mrf.mxu3 }
 0x109   : > { %v2248_v29 = vpop.f32.mrf.mxu0  ;;  %v682_v34 = vpop.f32.mrf.mxu2 }
 0x10a   : > { %v752_v35 = vpop.f32.mrf.mxu3  ;;  %v702_v45 = vadd.f32 %v682_v34, %v631_v25  ;;  %v424_v25 = vadd.f32 %v408_v47, %v347_v42 }
 0x10c   : > { %v772_v41 = vadd.f32 %v752_v35, %v702_v45  ;;  %v633_v35 = vadd.f32 %v616_v24, %v563_v23  ;;  %v494_v36 = vadd.f32 %v478_v48, %v424_v25 }
 0x10e   : > { %v564_v54 = vadd.f32 %v2218_v50, %v494_v36 }
 0x110   : > { %v634_v48 = vadd.f32 %v618_v26, %v564_v54  ;;  %v565_v26 = vadd.f32 %v2224_v55, %v495_v0 }
 0x111   : > { %v822_v5 = vpop.f32.mrf.mxu0  ;;  %v684_v49 = vpop.f32.mrf.mxu2 }
 0x112   : > { %v842_v8 = vadd.f32 %v822_v5, %v772_v41  ;;  %v754_v22 = vpop.f32.mrf.mxu3  ;;  %v703_v43 = vadd.f32 %v684_v49, %v632_v63  ;;  %v621_v63 = vpop.f32.mrf.mxu1 }
 0x114   : > { %v852_v12 = vmul.f32 %v2259_v58, %v842_v8  ;;  %v773_v44 = vadd.f32 %v754_v22, %v703_v43 }
 0x116   : > { %v862_v1 = vadd.f32 %v2264_v30, %v852_v12 }
 0x118   : > { %v870_v34 = vmax.f32 %v862_v1, 0.0 }
 0x119   : > { %v824_v37 = vpop.f32.mrf.mxu0  ;;  %v687_v45 = vpop.f32.mrf.mxu2 }
 0x11a   : > { %878 = vst.msk [vmem:[#allocation2 + $0x11] sm:$0xff] %vm205_vm0, %v870_v34  ;;  %v843_v62 = vadd.f32 %v824_v37, %v773_v44  ;;  %v757_v38 = vpop.f32.mrf.mxu3  ;;  %v704_v40 = vadd.f32 %v687_v45, %v633_v35  ;;  %v635_v44 = vadd.f32 %v621_v63, %v565_v26  ;;  %v623_v14 = vpop.f32.mrf.mxu1 }
 0x11c   : > { %v853_v33 = vmul.f32 %v2259_v58, %v843_v62  ;;  %v774_v41 = vadd.f32 %v757_v38, %v704_v40  ;;  %v427_v40 = vadd.f32 %v2232_v60, %v2203_v27 }
 0x11e   : > { %v863_v47 = vadd.f32 %v2264_v30, %v853_v33  ;;  %v497_v63 = vadd.f32 %v2234_v61, %v427_v40 }
 0x120   : > { %v871_v24 = vmax.f32 %v863_v47, 0.0 }
 0x121   : > { %v827_v5 = vpop.f32.mrf.mxu0  ;;  %v2276_v8 = vld [vmem:[#allocation2 + $0x11] sm:$0xff]  ;;  %v689_v43 = vpop.f32.mrf.mxu2 }
 0x122   : > { %v887_v49 = vld [vmem:[#allocation2 + $0x10] sm:$0xff]  ;;  %879 = vst.msk [vmem:[#allocation2 + $0x21] sm:$0xff] %vm205_vm0, %v871_v24  ;;  %v844_v50 = vadd.f32 %v827_v5, %v774_v41  ;;  %v908_v9 = vpack.c.bf16 %v2276_v8, %v2117_v20  ;;  %v759_v12 = vpop.f32.mrf.mxu3  ;;  %v705_v23 = vadd.f32 %v689_v43, %v634_v48  ;;  %v426_v20 = vadd.f32 %v2226_v56, %v352_v53 }
 0x123   : > { %v2278_v22 = vld [vmem:[#allocation2 + $0x12] sm:$0xff]  ;;  %v894_v52 = vpack.c.bf16 %v887_v49, %v2119_v21 }
 0x124   : > { %v1017_v42 = vpack.c.bf16 %v2278_v22, %v2145_v39  ;;  %v854_v25 = vmul.f32 %v2259_v58, %v844_v50  ;;  %1722 = vmatmul.msk.bf16.vlgmr.msra.gmra.mxu1 %vm205_vm0, %v908_v9  ;;  %v775_v39 = vadd.f32 %v759_v12, %v705_v23  ;;  %v496_v13 = vadd.f32 %v2228_v57, %v426_v20 }
 0x125   : > { %1730 = vmatmul.msk.bf16.vlgmr.msrb.gmra.mxu2 %vm205_vm0, %v894_v52  ;;  %v357_v9 = vadd.f32 %v2210_v32, %v2208_v31  ;;  %v567_v12 = vadd.f32 %v2236_v2, %v497_v63  ;;  %v1824_v31 = vld [vmem:[%s2561_s2 + $0x28] sm:$0xff]  ;;  %v1825_v32 = vld [vmem:[%s2561_s2 + $0x30] sm:$0xff] }
 0x126   : > { %1740 = vmatmul.msk.bf16.vlgmr.msrb.gmra.mxu3 %vm205_vm0, %v1017_v42  ;;  %v864_v21 = vadd.f32 %v2264_v30, %v854_v25  ;;  %v566_v38 = vadd.f32 %v2230_v59, %v496_v13  ;;  %v626_v42 = vpop.f32.mrf.mxu1  ;;  %1259 = vmatpush.bf16.msra.mxu2 %v1824_v31 }
 0x127   : > { %v428_v53 = vadd.f32 %v2238_v3, %v357_v9  ;;  %1329 = vmatpush.bf16.msra.mxu3 %v1825_v32  ;;  %v637_v2 = vadd.f32 %v626_v42, %v567_v12  ;;  %v1827_v9 = vld [vmem:[%s2561_s2 + $0x40] sm:$0xff] }
 0x128   : > { %v872_v1 = vmax.f32 %v864_v21, 0.0  ;;  %v636_v41 = vadd.f32 %v623_v14, %v566_v38  ;;  %1469 = vmatpush.bf16.msra.mxu1 %v1827_v9 }
 0x129   : > { %v829_v34 = vpop.f32.mrf.mxu0  ;;  %v1080_v35 = vld [vmem:[#allocation2 + $0x20] sm:$0xff]  ;;  %v692_v62 = vpop.f32.mrf.mxu2  ;;  %v498_v3 = vadd.f32 %v2240_v4, %v428_v53 }
 0x12a   : > { %880 = vst.msk [vmem:[#allocation2 + $0x31] sm:$0xff] %vm205_vm0, %v872_v1  ;;  %v845_v36 = vadd.f32 %v829_v34, %v775_v39  ;;  %v1087_v37 = vpack.c.bf16 %v1080_v35, %v887_v49  ;;  %v762_v55 = vpop.f32.mrf.mxu3  ;;  %v706_v45 = vadd.f32 %v692_v62, %v635_v44  ;;  %v2303_v46 = vld [vmem:[#allocation2 + $0x21] sm:$0xff] }
 0x12b   : > { %v2305_v47 = vld [vmem:[#allocation2 + $0x22] sm:$0xff] }
 0x12c   : > { %v855_v56 = vmul.f32 %v2259_v58, %v845_v36  ;;  %1750 = vmatmul.msk.bf16.vlgmr.msrb.gmra.mxu0 %vm205_vm0, %v1087_v37  ;;  %v776_v33 = vadd.f32 %v762_v55, %v706_v45  ;;  %v568_v36 = vadd.f32 %v2248_v29, %v498_v3 }
 0x12e   : > { %v865_v57 = vadd.f32 %v2264_v30, %v855_v56  ;;  %v628_v4 = vpop.f32.mrf.mxu1 }
 0x12f   : > { %v638_v38 = vadd.f32 %v628_v4, %v568_v36 }
 0x130   : > { %v873_v54 = vmax.f32 %v865_v57, 0.0 }
 0x131   : > { %v832_v24 = vpop.f32.mrf.mxu0  ;;  %v2308_v48 = vld [vmem:[#allocation2 + $0x31] sm:$0xff]  ;;  %v694_v61 = vpop.f32.mrf.mxu2 }
 0x132   : > { %v889_v0 = vld [vmem:[#allocation2 + $0x30] sm:$0xff]  ;;  %881 = vst.msk [vmem:[#allocation2 + $0x41] sm:$0xff] %vm205_vm0, %v873_v54  ;;  %v846_v27 = vadd.f32 %v832_v24, %v776_v33  ;;  %v2315_v59 = vpack.c.bf16 %v2308_v48, %v2303_v46  ;;  %v764_v50 = vpop.f32.mrf.mxu3  ;;  %v707_v52 = vadd.f32 %v694_v61, %v636_v41 }
 0x133   : > { %v2310_v5 = vld [vmem:[#allocation2 + $0x32] sm:$0xff]  ;;  %v2317_v60 = vpack.c.bf16 %v889_v0, %v1080_v35 }
 0x134   : > { %v2321_v49 = vpack.c.bf16 %v2310_v5, %v2305_v47  ;;  %v856_v43 = vmul.f32 %v2259_v58, %v846_v27  ;;  %1723 = vmatmul.msk.bf16.gmra.mxu1 %vm205_vm0, %v2315_v59  ;;  %v777_v25 = vadd.f32 %v764_v50, %v707_v52  ;;  %v1826_v35 = vld [vmem:[%s2561_s2 + $0x38] sm:$0xff] }
 0x135   : > { %1731 = vmatmul.msk.bf16.gmra.mxu2 %vm205_vm0, %v2317_v60  ;;  %1399 = vmatpush.bf16.msra.mxu0 %v1826_v35 }
 0x136   : > { %1741 = vmatmul.msk.bf16.gmra.mxu3 %vm205_vm0, %v2321_v49  ;;  %v866_v23 = vadd.f32 %v2264_v30, %v856_v43 }
 0x138   : > { %v874_v26 = vmax.f32 %v866_v23, 0.0 }
 0x139   : > { %v834_v20 = vpop.f32.mrf.mxu0  ;;  %v1082_v21 = vld [vmem:[#allocation2 + $0x40] sm:$0xff]  ;;  %v697_v44 = vpop.f32.mrf.mxu2 }
 0x13a   : > { %882 = vst.msk [vmem:[#allocation2 + $0x51] sm:$0xff] %vm205_vm0, %v874_v26  ;;  %v847_v39 = vadd.f32 %v834_v20, %v777_v25  ;;  %v1088_v1 = vpack.c.bf16 %v1082_v21, %v889_v0  ;;  %v708_v13 = vadd.f32 %v697_v44, %v637_v2  ;;  %v767_v14 = vpop.f32.mrf.mxu3  ;;  %v904_v45 = vld [vmem:[#allocation2 + $0x41] sm:$0xff] }
 0x13b   : > { %v1013_v56 = vld [vmem:[#allocation2 + $0x42] sm:$0xff]  ;;  %v1158_v35 = vpack.c.bf16 %v904_v45, %v2308_v48 }
 0x13c   : > { %v857_v34 = vmul.f32 %v2259_v58, %v847_v39  ;;  %1751 = vmatmul.msk.bf16.gmra.mxu0 %vm205_vm0, %v1088_v1  ;;  %v778_v62 = vadd.f32 %v767_v14, %v708_v13  ;;  %v1228_v36 = vpack.c.bf16 %v1013_v56, %v2310_v5 }
 0x13e   : > { %v867_v37 = vadd.f32 %v2264_v30, %v857_v34  ;;  %v1227_v34 = vpack.c.bf16 %v2305_v47, %v2278_v22 }
 0x140   : > { %v875_v55 = vmax.f32 %v867_v37, 0.0 }
 0x141   : > { %v837_v40 = vpop.f32.mrf.mxu0  ;;  %v905_v57 = vld [vmem:[#allocation2 + $0x51] sm:$0xff]  ;;  %v699_v29 = vpop.f32.mrf.mxu2 }
 0x142   : > { %v891_v33 = vld [vmem:[#allocation2 + $0x50] sm:$0xff]  ;;  %883 = vst.msk [vmem:[#allocation2 + $0x61] sm:$0xff] %vm205_vm0, %v875_v55  ;;  %v848_v41 = vadd.f32 %v837_v40, %v778_v62  ;;  %v910_v63 = vpack.c.bf16 %v905_v57, %v904_v45  ;;  %v709_v27 = vadd.f32 %v699_v29, %v638_v38  ;;  %v769_v50 = vpop.f32.mrf.mxu3 }
 0x143   : > { %v1014_v54 = vld [vmem:[#allocation2 + $0x52] sm:$0xff]  ;;  %v896_v24 = vpack.c.bf16 %v891_v33, %v1082_v21 }
 0x144   : > { %v2351_v0 = vpack.c.bf16 %v1014_v54, %v1013_v56  ;;  %v858_v61 = vmul.f32 %v2259_v58, %v848_v41  ;;  %1724 = vmatmul.msk.bf16.gmra.mxu1 %vm205_vm0, %v910_v63  ;;  %v779_v42 = vadd.f32 %v769_v50, %v709_v27 }
 0x145   : > { %1732 = vmatmul.msk.bf16.gmra.mxu2 %vm205_vm0, %v896_v24 }
 0x146   : > { %1742 = vmatmul.msk.bf16.gmra.mxu3 %vm205_vm0, %v2351_v0  ;;  %v868_v52 = vadd.f32 %v2264_v30, %v858_v61 }
 0x148   : > { %v876_v43 = vmax.f32 %v868_v52, 0.0 }
 0x149   : > { %v839_v12 = vpop.f32.mrf.mxu0  ;;  %v1084_v53 = vld [vmem:[#allocation2 + $0x60] sm:$0xff] }
 0x14a   : > { %884 = vst.msk [vmem:[#allocation2 + $0x71] sm:$0xff] %vm205_vm0, %v876_v43  ;;  %v849_v31 = vadd.f32 %v839_v12, %v779_v42  ;;  %v1089_v32 = vpack.c.bf16 %v1084_v53, %v891_v33  ;;  %v906_v2 = vld [vmem:[#allocation2 + $0x61] sm:$0xff] }
 0x14b   : > { %v1015_v3 = vld [vmem:[#allocation2 + $0x62] sm:$0xff] }
 0x14c   : > { %v859_v23 = vmul.f32 %v2259_v58, %v849_v31  ;;  %1752 = vmatmul.msk.bf16.gmra.mxu0 %vm205_vm0, %v1089_v32  ;;  %v1229_v22 = vpack.c.bf16 %v1015_v3, %v1014_v54 }
 0x14e   : > { %v869_v25 = vadd.f32 %v2264_v30, %v859_v23  ;;  %v1157_v30 = vpack.c.bf16 %v2303_v46, %v2276_v8  ;;  %v1159_v8 = vpack.c.bf16 %v906_v2, %v905_v57 }
 0x150   : > { %v877_v26 = vmax.f32 %v869_v25, 0.0 }
 0x151   : > { %v907_v20 = vld [vmem:[#allocation2 + $0x71] sm:$0xff] }
 0x152   : > { %v893_v21 = vld [vmem:[#allocation2 + $0x70] sm:$0xff]  ;;  %885 = vst.msk [vmem:[#allocation2 + $0x81] sm:$0xff] %vm205_vm0, %v877_v26  ;;  %v911_v1 = vpack.c.bf16 %v907_v20, %v906_v2 }
 0x153   : > { %v1016_v39 = vld [vmem:[#allocation2 + $0x72] sm:$0xff]  ;;  %v897_v44 = vpack.c.bf16 %v893_v21, %v1084_v53 }
 0x154   : > { %v1020_v13 = vpack.c.bf16 %v1016_v39, %v1015_v3  ;;  %1725 = vmatmul.msk.bf16.gmra.mxu1 %vm205_vm0, %v911_v1 }
 0x155   : > { %1733 = vmatmul.msk.bf16.gmra.mxu2 %vm205_vm0, %v897_v44 }
 0x156   : > { %1743 = vmatmul.msk.bf16.gmra.mxu3 %vm205_vm0, %v1020_v13 }
 0x159   : > { %v1086_v58 = vld [vmem:[#allocation2 + $0x80] sm:$0xff] }
 0x15a   : > { %v1090_v14 = vpack.c.bf16 %v1086_v58, %v893_v21  ;;  %v1156_v46 = vld [vmem:[#allocation2 + $0x81] sm:$0xff] }
 0x15b   : > { %v1226_v47 = vld [vmem:[#allocation2 + $0x82] sm:$0xff]  ;;  %v1160_v48 = vpack.c.bf16 %v1156_v46, %v907_v20 }
 0x15c   : > { %1753 = vmatmul.msk.bf16.gmra.mxu0 %vm205_vm0, %v1090_v14  ;;  %v1230_v5 = vpack.c.bf16 %v1226_v47, %v1016_v39 }
 0x164   : > { %1760 = vmatmul.msk.bf16.vlgmr.msrb.gmra.mxu1 %vm205_vm0, %v1157_v30 }
 0x165   : > { %1770 = vmatmul.msk.bf16.vlgmr.msra.gmra.mxu2 %vm205_vm0, %v1227_v34 }
 0x166   : > { %1780 = vmatmul.msk.bf16.vlgmr.msra.gmra.mxu3 %vm205_vm0, %v2317_v60  ;;  %v1370_v60 = vpack.c.bf16 %v2192_v11, %v1156_v46 }
 0x16c   : > { %1790 = vmatmul.msk.bf16.vlgmr.msra.gmra.mxu0 %vm205_vm0, %v2315_v59  ;;  %v1300_v59 = vpack.c.bf16 %v2190_v10, %v1086_v58 }
 0x174   : > { %1761 = vmatmul.msk.bf16.gmra.mxu1 %vm205_vm0, %v1158_v35 }
 0x175   : > { %1771 = vmatmul.msk.bf16.gmra.mxu2 %vm205_vm0, %v1228_v36 }
 0x176   : > { %1781 = vmatmul.msk.bf16.gmra.mxu3 %vm205_vm0, %v896_v24 }
 0x17c   : > { %1791 = vmatmul.msk.bf16.gmra.mxu0 %vm205_vm0, %v910_v63  ;;  %v1440_v63 = vpack.c.bf16 %v2205_v28, %v1226_v47 }
 0x184   : > { %1762 = vmatmul.msk.bf16.gmra.mxu1 %vm205_vm0, %v1159_v8 }
 0x185   : > { %1772 = vmatmul.msk.bf16.gmra.mxu2 %vm205_vm0, %v1229_v22 }
 0x186   : > { %1782 = vmatmul.msk.bf16.gmra.mxu3 %vm205_vm0, %v897_v44 }
 0x18c   : > { %1792 = vmatmul.msk.bf16.gmra.mxu0 %vm205_vm0, %v911_v1 }
 0x194   : > { %1763 = vmatmul.msk.bf16.gmra.mxu1 %vm205_vm0, %v1160_v48 }
 0x195   : > { %1773 = vmatmul.msk.bf16.gmra.mxu2 %vm205_vm0, %v1230_v5 }
 0x196   : > { %1783 = vmatmul.msk.bf16.gmra.mxu3 %vm205_vm0, %v1300_v59 }
 0x19c   : > { %1793 = vmatmul.msk.bf16.gmra.mxu0 %vm205_vm0, %v1370_v60 }
 0x1a1   : > { %v942_v4 = vpop.f32.mrf.mxu1 }
 0x1a4   : > { %1800 = vmatmul.msk.bf16.vlgmr.msra.gmra.mxu1 %vm205_vm0, %v2321_v49 }
 0x1a8   : > { %v989_v10 = vpop.f32.mrf.mxu2 }
 0x1a9   : > { %v944_v37 = vpop.f32.mrf.mxu1  ;;  %v1051_v45 = vpop.f32.mrf.mxu3  ;;  %v990_v44 = vadd.f32 %v989_v10, %v942_v4 }
 0x1aa   : > { %v1121_v56 = vpop.f32.mrf.mxu0 }
 0x1ab   : > { %v1071_v58 = vadd.f32 %v1051_v45, %v990_v44 }
 0x1ad   : > { %v1141_v35 = vadd.f32 %v1121_v56, %v1071_v58 }
 0x1b0   : > { %v991_v38 = vpop.f32.mrf.mxu2 }
 0x1b1   : > { %v947_v62 = vpop.f32.mrf.mxu1  ;;  %v1053_v11 = vpop.f32.mrf.mxu3  ;;  %v992_v36 = vadd.f32 %v991_v38, %v944_v37  ;;  %v2451_v37 = vld [vmem:[%s2562_s3 + $0x2] ss:$0 sm:$0xff] }
 0x1b2   : > { %v1123_v33 = vpop.f32.mrf.mxu0 }
 0x1b3   : > { %v1072_v46 = vadd.f32 %v1053_v11, %v992_v36 }
 0x1b4   : > { %1801 = vmatmul.msk.bf16.gmra.mxu1 %vm205_vm0, %v2351_v0 }
 0x1b5   : > { %v1142_v60 = vadd.f32 %v1123_v33, %v1072_v46 }
 0x1b8   : > { %v994_v49 = vpop.f32.mrf.mxu2 }
 0x1b9   : > { %v2401_v55 = vpop.f32.mrf.mxu1  ;;  %v1056_v54 = vpop.f32.mrf.mxu3 }
 0x1ba   : > { %v1126_v24 = vpop.f32.mrf.mxu0 }
 0x1c0   : > { %v996_v0 = vpop.f32.mrf.mxu2 }
 0x1c1   : > { %v2403_v40 = vpop.f32.mrf.mxu1  ;;  %v1058_v27 = vpop.f32.mrf.mxu3  ;;  %v997_v33 = vadd.f32 %v996_v0, %v2401_v55 }
 0x1c2   : > { %v2414_v61 = vpop.f32.mrf.mxu0 }
 0x1c4   : > { %1802 = vmatmul.msk.bf16.gmra.mxu1 %vm205_vm0, %v1020_v13 }
 0x1c8   : > { %v2416_v50 = vpop.f32.mrf.mxu2 }
 0x1c9   : > { %v2406_v57 = vpop.f32.mrf.mxu1  ;;  %v2418_v52 = vpop.f32.mrf.mxu3  ;;  %v1000_v55 = vadd.f32 %v2416_v50, %v2403_v40 }
 0x1ca   : > { %v2420_v42 = vpop.f32.mrf.mxu0 }
 0x1d0   : > { %v2422_v43 = vpop.f32.mrf.mxu2 }
 0x1d1   : > { %v2408_v41 = vpop.f32.mrf.mxu1  ;;  %v2424_v28 = vpop.f32.mrf.mxu3 }
 0x1d2   : > { %v2426_v31 = vpop.f32.mrf.mxu0 }
 0x1d4   : > { %1803 = vmatmul.msk.bf16.gmra.mxu1 %vm205_vm0, %v1440_v63  ;;  %v995_v63 = vadd.f32 %v994_v49, %v947_v62 }
 0x1d6   : > { %v1073_v45 = vadd.f32 %v1056_v54, %v995_v63 }
 0x1d8   : > { %v2428_v32 = vpop.f32.mrf.mxu2  ;;  %v1143_v62 = vadd.f32 %v1126_v24, %v1073_v45  ;;  %v1002_v45 = vadd.f32 %v2422_v43, %v2406_v57 }
 0x1d9   : > { %v2412_v29 = vpop.f32.mrf.mxu1  ;;  %v2430_v23 = vpop.f32.mrf.mxu3 }
 0x1da   : > { %v2432_v26 = vpop.f32.mrf.mxu0 }
 0x1e0   : > { %v2434_v2 = vpop.f32.mrf.mxu2 }
 0x1e1   : > { %v1191_v9 = vpop.f32.mrf.mxu1  ;;  %v2438_v20 = vpop.f32.mrf.mxu3 }
 0x1e2   : > { %v2440_v21 = vpop.f32.mrf.mxu0  ;;  %v1211_v8 = vadd.f32 %v1191_v9, %v1141_v35  ;;  %v2456_v9 = vld [vmem:[%s2562_s3 + $0x3] ss:$0 sm:$0xff] }
 0x1e8   : > { %v1261_v39 = vpop.f32.mrf.mxu2 }
 0x1e9   : > { %v1193_v12 = vpop.f32.mrf.mxu1  ;;  %v1331_v13 = vpop.f32.mrf.mxu3  ;;  %v1281_v47 = vadd.f32 %v1261_v39, %v1211_v8 }
 0x1ea   : > { %v1401_v14 = vpop.f32.mrf.mxu0  ;;  %v1212_v10 = vadd.f32 %v1193_v12, %v1142_v60 }
 0x1eb   : > { %v1351_v4 = vadd.f32 %v1331_v13, %v1281_v47 }
 0x1ed   : > { %v1421_v44 = vadd.f32 %v1401_v14, %v1351_v4  ;;  %v1074_v14 = vadd.f32 %v1058_v27, %v997_v33 }
 0x1f0   : > { %v1263_v30 = vpop.f32.mrf.mxu2 }
 0x1f1   : > { %v1196_v53 = vpop.f32.mrf.mxu1  ;;  %v1333_v22 = vpop.f32.mrf.mxu3  ;;  %v1282_v51 = vadd.f32 %v1263_v30, %v1212_v10 }
 0x1f2   : > { %v1403_v5 = vpop.f32.mrf.mxu0  ;;  %v1213_v13 = vadd.f32 %v1196_v53, %v1143_v62 }
 0x1f3   : > { %v1352_v49 = vadd.f32 %v1333_v22, %v1282_v51  ;;  %v1144_v51 = vadd.f32 %v2414_v61, %v1074_v14 }
 0x1f5   : > { %v1422_v30 = vadd.f32 %v1403_v5, %v1352_v49 }
 0x1f8   : > { %v1266_v59 = vpop.f32.mrf.mxu2 }
 0x1f9   : > { %v1198_v25 = vpop.f32.mrf.mxu1  ;;  %v1336_v56 = vpop.f32.mrf.mxu3  ;;  %v1283_v35 = vadd.f32 %v1266_v59, %v1213_v13  ;;  %v1075_v59 = vadd.f32 %v2418_v52, %v1000_v55 }
 0x1fa   : > { %v1406_v54 = vpop.f32.mrf.mxu0  ;;  %v1214_v53 = vadd.f32 %v1198_v25, %v1144_v51 }
 0x1fb   : > { %v1353_v0 = vadd.f32 %v1336_v56, %v1283_v35  ;;  %v1145_v10 = vadd.f32 %v2420_v42, %v1075_v59 }
 0x1fd   : > { %v1423_v61 = vadd.f32 %v1406_v54, %v1353_v0 }
 0x200   : > { %v1268_v39 = vpop.f32.mrf.mxu2 }
 0x201   : > { %v2436_v3 = vpop.f32.mrf.mxu1  ;;  %v1338_v47 = vpop.f32.mrf.mxu3  ;;  %v1284_v60 = vadd.f32 %v1268_v39, %v1214_v53  ;;  %v1005_v39 = vadd.f32 %v2428_v32, %v2408_v41 }
 0x202   : > { %v1215_v52 = vadd.f32 %v2436_v3, %v1145_v10 }
 0x203   : > { %v1077_v14 = vadd.f32 %v2430_v23, %v1005_v39 }
 0x208   : > { %v1271_v5 = vpop.f32.mrf.mxu2 }
 0x209   : > { %v2442_v1 = vpop.f32.mrf.mxu1  ;;  %v1341_v56 = vpop.f32.mrf.mxu3  ;;  %v1285_v62 = vadd.f32 %v1271_v5, %v1215_v52 }
 0x20b   : > { %v1355_v13 = vadd.f32 %v1341_v56, %v1285_v62 }
 0x210   : > { %v1273_v49 = vpop.f32.mrf.mxu2 }
 0x211   : > { %v2444_v34 = vpop.f32.mrf.mxu1 }
 0x219   : > { %v2446_v48 = vpop.f32.mrf.mxu1 }
 0x221   : > { %v1471_v38 = vpop.f32.mrf.mxu1 }
 0x222   : > { %v1491_v11 = vadd.f32 %v1471_v38, %v1421_v44  ;;  %v1354_v44 = vadd.f32 %v1338_v47, %v1284_v60  ;;  %v1007_v47 = vadd.f32 %v2434_v2, %v2412_v29 }
 0x224   : > { %v1501_v12 = vmul.f32 %v2451_v37, %v1491_v11  ;;  %v1078_v55 = vadd.f32 %v2438_v20, %v1007_v47 }
 0x226   : > { %v1511_v58 = vadd.f32 %v2456_v9, %v1501_v12  ;;  %v1148_v2 = vadd.f32 %v2440_v21, %v1078_v55 }
 0x228   : > { %v1519_v36 = vadd.f32 %v1511_v58, %v2091_v15  ;;  %v1408_v15 = vpop.f32.mrf.mxu0  ;;  %v1218_v20 = vadd.f32 %v2446_v48, %v1148_v2 }
 0x229   : > { %v1473_v8 = vpop.f32.mrf.mxu1  ;;  %v1424_v11 = vadd.f32 %v1408_v15, %v1354_v44 }
 0x22a   : > { %v1527_v46 = vmax.f32 %v1519_v36, 0.0  ;;  %v1492_v24 = vadd.f32 %v1473_v8, %v1422_v30 }
 0x22c   : > { %1535 = vst.msk [vmem:[%s2468_s27] sm:$0xff] %vm205_vm0, %v1527_v46  ;;  %v1502_v27 = vmul.f32 %v2451_v37, %v1492_v24  ;;  %v1276_v46 = vpop.f32.mrf.mxu2  ;;  %v1147_v24 = vadd.f32 %v2432_v26, %v1077_v14 }
 0x22e   : > { %v1512_v22 = vadd.f32 %v2456_v9, %v1502_v27  ;;  %v1217_v51 = vadd.f32 %v2444_v34, %v1147_v24 }
 0x230   : > { %v1520_v40 = vadd.f32 %v1512_v22, %v2104_v18  ;;  %v1076_v18 = vadd.f32 %v2424_v28, %v1002_v45  ;;  %v1411_v33 = vpop.f32.mrf.mxu0  ;;  %v1287_v27 = vadd.f32 %v1276_v46, %v1217_v51 }
 0x231   : > { %v1476_v50 = vpop.f32.mrf.mxu1  ;;  %v1425_v30 = vadd.f32 %v1411_v33, %v1355_v13  ;;  %v2568_v33 = vld [vmem:[#allocation6_spill] sm:$0xff] }
 0x232   : > { %v1528_v63 = vmax.f32 %v1520_v40, 0.0  ;;  %v1493_v4 = vadd.f32 %v1476_v50, %v1423_v61  ;;  %v1146_v12 = vadd.f32 %v2426_v31, %v1076_v18 }
 0x234   : > { %1536 = vst.msk [vmem:[%s2468_s27 + $0x8] sm:$0xff] %vm205_vm0, %v1528_v63  ;;  %v1503_v25 = vmul.f32 %v2451_v37, %v1493_v4  ;;  %v1216_v28 = vadd.f32 %v2442_v1, %v1146_v12  ;;  %v1278_v61 = vpop.f32.mrf.mxu2 }
 0x235   : > { %v1288_v40 = vadd.f32 %v1278_v61, %v1218_v20 }
 0x236   : > { %v1513_v38 = vadd.f32 %v2456_v9, %v1503_v25  ;;  %v1286_v35 = vadd.f32 %v1273_v49, %v1216_v28 }
 0x238   : > { %v1521_v42 = vadd.f32 %v1513_v38, %v2109_v19  ;;  %v1343_v19 = vpop.f32.mrf.mxu3  ;;  %v1413_v32 = vpop.f32.mrf.mxu0 }
 0x239   : > { %v1478_v57 = vpop.f32.mrf.mxu1  ;;  %v1356_v1 = vadd.f32 %v1343_v19, %v1286_v35 }
 0x23a   : > { %v1529_v43 = vmax.f32 %v1521_v42, 0.0  ;;  %v1494_v54 = vadd.f32 %v1478_v57, %v1424_v11 }
 0x23b   : > { %v1426_v0 = vadd.f32 %v1413_v32, %v1356_v1 }
 0x23c   : > { %1537 = vst.msk [vmem:[%s2468_s27 + $0x10] sm:$0xff] %vm205_vm0, %v1529_v43  ;;  %v1504_v3 = vmul.f32 %v2451_v37, %v1494_v54 }
 0x23e   : > { %v1514_v58 = vadd.f32 %v2456_v9, %v1504_v3 }
 0x240   : > { %v1522_v31 = vadd.f32 %v1514_v58, %v2045_v6  ;;  %v1346_v26 = vpop.f32.mrf.mxu3  ;;  %v1416_v59 = vpop.f32.mrf.mxu0 }
 0x241   : > { %v1481_v36 = vpop.f32.mrf.mxu1  ;;  %v1357_v5 = vadd.f32 %v1346_v26, %v1287_v27 }
 0x242   : > { %v1530_v8 = vmax.f32 %v1522_v31, 0.0  ;;  %v1495_v41 = vadd.f32 %v1481_v36, %v1425_v30 }
 0x244   : > { %1538 = vst.msk [vmem:[%s2468_s27 + $0x18] sm:$0xff] %vm205_vm0, %v1530_v8  ;;  %v1505_v23 = vmul.f32 %v2451_v37, %v1495_v41 }
 0x246   : > { %v1515_v6 = vadd.f32 %v2456_v9, %v1505_v23 }
 0x248   : > { %v1523_v53 = vadd.f32 %v1515_v6, %v2048_v7  ;;  %v1427_v7 = vadd.f32 %v1416_v59, %v1357_v5  ;;  %v1348_v10 = vpop.f32.mrf.mxu3  ;;  %v1418_v25 = vpop.f32.mrf.mxu0 }
 0x249   : > { %v1483_v15 = vpop.f32.mrf.mxu1  ;;  %v1358_v45 = vadd.f32 %v1348_v10, %v1288_v40 }
 0x24a   : > { %v1531_v22 = vmax.f32 %v1523_v53, 0.0  ;;  %v1496_v29 = vadd.f32 %v1483_v15, %v1426_v0 }
 0x24b   : > { %v1428_v56 = vadd.f32 %v1418_v25, %v1358_v45 }
 0x24c   : > { %1539 = vst.msk [vmem:[%s2468_s27 + $0x20] sm:$0xff] %vm205_vm0, %v1531_v22  ;;  %v1506_v34 = vmul.f32 %v2451_v37, %v1496_v29 }
 0x24e   : > { %v1516_v60 = vadd.f32 %v2456_v9, %v1506_v34 }
 0x250   : > { %v1524_v50 = vadd.f32 %v1516_v60, %v2095_v16 }
 0x251   : > { %v1486_v63 = vpop.f32.mrf.mxu1 }
 0x252   : > { %v1532_v21 = vmax.f32 %v1524_v50, 0.0  ;;  %v1497_v4 = vadd.f32 %v1486_v63, %v1427_v7 }
 0x254   : > { %1540 = vst.msk [vmem:[%s2468_s27 + $0x28] sm:$0xff] %vm205_vm0, %v1532_v21  ;;  %v1507_v44 = vmul.f32 %v2451_v37, %v1497_v4 }
 0x256   : > { %v1517_v48 = vadd.f32 %v2456_v9, %v1507_v44 }
 0x258   : > { %v1525_v52 = vadd.f32 %v1517_v48, %v2099_v17 }
 0x259   : > { %v1488_v16 = vpop.f32.mrf.mxu1 }
 0x25a   : > { %v1533_v38 = vmax.f32 %v1525_v52, 0.0  ;;  %v1498_v18 = vadd.f32 %v1488_v16, %v1428_v56 }
 0x25c   : > { %1541 = vst.msk [vmem:[%s2468_s27 + $0x30] sm:$0xff] %vm205_vm0, %v1533_v38  ;;  %v1508_v11 = vmul.f32 %v2451_v37, %v1498_v18 }
 0x25e   : > { %v1518_v62 = vadd.f32 %v2456_v9, %v1508_v11 }
 0x260   : > { %v1526_v17 = vadd.f32 %v1518_v62, %v2568_v33 }
 0x262   : > { %v1534_v42 = vmax.f32 %v1526_v17, 0.0 }
 0x264   : > { %1542 = vst.msk [vmem:[%s2468_s27 + $0x38] sm:$0xff] %vm205_vm0, %v1534_v42 }
 0x265   : > { %1904 = shalt.err (!%p1901_p3)
}
 0x266   : > { %s1942_s20 = smov 128   ;;  %s1943_s22 = smov 8  }
 0x267   : > { %1831 = dma.vmem_to_hbm [thread:$0]  (%p2007_p5), %s1557_s6, 1024, %s1559_s7, %s1544_s19, %s1942_s20, %s1942_s20, %s1943_s22  }
 0x268 PF: > { %p1837_p4 = scmp.ge.s32.totalorder %s1939_s18, 2  ;;  %s1573_s23 = sand.u32 1, %s1927_s15  }
 0x269   : > { %s1574_s27 = scalar_lea.sflag [#allocation4], %s1573_s23 }
 0x26a   : > { %p1834_p7 = pnand %p1837_p4, %p2011_p6 }
 0x26c   : > { %p1835_p8 = pneg %p1834_p7 }
 0x26e   : > { %1922 = dma.done.wait (%p1835_p8), %s1574_s27, 1024  }
 0x26f   : > { %1924 = vsyncadd (%p1835_p8), %s1574_s27, 4294966272  ;;  %p14_p9 = scmp.ge.s32.totalorder %s1994_s21, 4   ;;  %s2569_s15 = smov %s1931_s16 }
 0x270   : > { %s2570_s16 = smov %s1935_s17  ;;  %s2571_s17 = smov %s2005_s24 }
 0x271   : > { %s2572_s18 = smov %s1994_s21  ;;  %16 = sbr.rel (!%p14_p9) target bundleno = 3 (0x3), region = 89 }
 0x276   :  { %1580 = vsyncpa [#allocation4], 1 }
 0x277   :  { %1582 = vsyncpa [#allocation4 + $0x1], 1 }

</bundles_post_ra>
